<compile_context>
chip_gen: v6e
topology: v6e:2x2x1
jax: 0.10.0
libtpu: 0.0.40
codegen_flags: <defaults>
</compile_context>

<pallas_src>
import functools

import jax
import jax.numpy as jnp
from jax.experimental import pallas as pl
from jax.experimental.pallas import tpu as pltpu

_MB = 1024 * 1024


def _round_up(a, b):
    return -(-a // b) * b


def _leaky_relu(v, negative_slope):
    return jnp.where(v >= 0, v, negative_slope * v)


# ---------------------------------------------------------------------------
# Fused path (stride == 1): unfold + spatially-varying multiply + conv + LeakyReLU
# ---------------------------------------------------------------------------

def _sam_fused_kernel(svk_ref, w_ref, x_ref, o_ref, xbuf, sem, *,
                      input_channels, kernel_size, tile_h, w_out,
                      out_channels, negative_slope):
    """One row-tile of the output.

    svk_ref : (CKK, TH, W_out)  VMEM block of the spatially varying kernel features
    w_ref   : (O-1, CKK)        SMEM conv weights (read as scalars)
    x_ref   : (C, Hp, Wp)       zero-padded input, raw HBM ref (pl.ANY)
    o_ref   : (O, TH, W_out)    output block
    xbuf    : (C, TH+k-1, Wp)   VMEM scratch for the row-haloed x window
    """
    C, K, TH = input_channels, kernel_size, tile_h
    KK = K * K
    halo_rows = TH + K - 1

    # Manual DMA of the haloed x rows for this row-tile.  x traffic is ~k^2 smaller than
    # the svk block the auto-pipeline is streaming concurrently, so a start+wait is fine.
    r0 = pl.program_id(0) * TH
    cp = pltpu.make_async_copy(x_ref.at[:, pl.ds(r0, halo_rows), :], xbuf, sem.at[0])
    cp.start()
    cp.wait()

    # TODO(synk): for large C / output_channels an MXU-based contraction would be
    # preferable; for the small channel counts of this module the VPU path below stays
    # under the HBM roofline on v5e/v6e/v7x.
    acc = [None] * out_channels
    for c in range(C):
        for kh in range(K):
            for kw in range(K):
                r = c * KK + kh * K + kw                       # torch unfold row order
                patch = xbuf[c, pl.ds(kh, TH), pl.ds(kw, w_out)]   # (TH, W_out)
                feat = (patch * svk_ref[r]).astype(jnp.float32)    # sv_feature row
                # output channel 0: spatially-varying channel sum (fused "ones" weight)
                acc[0] = feat if acc[0] is None else acc[0] + feat
                # remaining channels: learned conv weights as SMEM scalars
                for o in range(1, out_channels):
                    t = w_ref[o - 1, r] * feat
                    acc[o] = t if acc[o] is None else acc[o] + t

    for o in range(out_channels):
        o_ref[o] = _leaky_relu(acc[o], negative_slope).astype(o_ref.dtype)


def _pick_row_tile(h_out, w_out, per_elem_bytes, vmem_budget):
    """Largest multiple-of-8 row tile that fits the VMEM budget, divides h_out exactly
    and leaves >= 2 grid steps when the image is tall enough (v7x megacore)."""
    cap_elems = int(max(1024, min(vmem_budget // max(per_elem_bytes, 1), 128 * 1024)))
    th_cap = max(8, (cap_elems // max(w_out, 1)) // 8 * 8)
    if h_out >= 16:
        th_cap = min(th_cap, max(8, (h_out // 2) // 8 * 8))
    th_cap = min(th_cap, max(8, (h_out // 8) * 8))
    for cand in range(th_cap, 7, -8):
        if h_out % cand == 0:
            return cand
    if h_out * w_out <= cap_elems:
        return h_out        # single full-height tile (block dims equal full dims)
    return None             # caller falls back to the unfused path


def _forward_fused(x, svk, weight, kernel_size, padding, negative_slope, tile_h):
    n, c, h, w = x.shape
    k = kernel_size
    p = padding
    h_out = h + 2 * p - k + 1
    w_out = w + 2 * p - k + 1
    ckk = c * k * k
    o_minus_1 = weight.shape[0]
    out_channels = o_minus_1 + 1
    dtype = x.dtype
    isz = jnp.dtype(dtype).itemsize

    # Spatially varying kernel viewed as (CKK, H_out, W_out); identical to torch's flatten.
    svk3 = svk.reshape(ckk, h_out, w_out)
    # Zero-padded input (cheap: x is ~k^2 smaller than svk).  Halo rows are DMA'd from it.
    xp = jnp.pad(x[0], ((0, 0), (p, p), (p, p)))
    hp, wp = h + 2 * p, w + 2 * p

    w_mat = weight.reshape(o_minus_1, ckk).astype(jnp.float32)   # SMEM scalar table

    grid = h_out // tile_h  # exact by construction (or 1 when tile_h == h_out)

    # VMEM working set (double-buffered svk/out blocks + halo buffer + live intermediates).
    svk_block = ckk * tile_h * w_out * isz
    out_block = out_channels * tile_h * w_out * isz
    xbuf_bytes = c * (tile_h + k - 1) * wp * isz
    interm = (out_channels + 3) * tile_h * w_out * 4
    need = 2 * svk_block + 2 * out_block + xbuf_bytes + interm
    # Never request the full physical VMEM (v7x has only 64 MiB) -> cap at 48 MiB.
    vmem_limit = int(min(48 * _MB, max(32 * _MB, need + 8 * _MB)))

    l_total = h_out * w_out
    cost = pl.CostEstimate(
        flops=2 * (ckk + o_minus_1 * ckk) * l_total,
        transcendentals=0,
        bytes_accessed=(ckk * l_total * isz + c * hp * wp * isz
                        + out_channels * l_total * isz + o_minus_1 * ckk * 4),
    )

    kernel = functools.partial(
        _sam_fused_kernel,
        input_channels=c, kernel_size=k, tile_h=tile_h, w_out=w_out,
        out_channels=out_channels, negative_slope=negative_slope)

    out = pl.pallas_call(
        kernel,
        out_shape=jax.ShapeDtypeStruct((out_channels, h_out, w_out), dtype),
        grid_spec=pltpu.PrefetchScalarGridSpec(
            num_scalar_prefetch=0,
            grid=(grid,),
            in_specs=[
                pl.BlockSpec((ckk, tile_h, w_out), lambda i: (0, i, 0)),   # svk row-tile
                pl.BlockSpec(memory_space=pltpu.MemorySpace.SMEM),         # conv weights
                pl.BlockSpec(memory_space=pl.ANY),                         # padded x (HBM)
            ],
            out_specs=pl.BlockSpec((out_channels, tile_h, w_out), lambda i: (0, i, 0)),
            scratch_shapes=[
                pltpu.VMEM((c, tile_h + k - 1, wp), dtype),
                pltpu.SemaphoreType.DMA((1,)),
            ]),
        compiler_params=pltpu.CompilerParams(
            dimension_semantics=("parallel",),   # independent row tiles -> v7x megacore
            vmem_limit_bytes=vmem_limit),
        cost_estimate=cost,
    )(svk3, w_mat, xp)

    return out.reshape(1, out_channels, h_out, w_out)


# ---------------------------------------------------------------------------
# Generic fallback: materialized unfold + flat lane-tiled MXU matmul
# (used for stride != 1 or spatial sizes the fused path cannot tile cleanly)
# ---------------------------------------------------------------------------

def _unfold_nchw(x, kernel_size, stride, padding):
    """torch.nn.functional.unfold for a single image x: (C, H, W) -> (C*k*k, L)."""
    c, h, w = x.shape
    k = kernel_size
    xp = jnp.pad(x, ((0, 0), (padding, padding), (padding, padding)))
    h_out = (h + 2 * padding - k) // stride + 1
    w_out = (w + 2 * padding - k) // stride + 1
    patches = []
    for i in range(k):
        for j in range(k):
            patches.append(xp[:, i:i + stride * h_out:stride, j:j + stride * w_out:stride])
    p = jnp.stack(patches, axis=1)                     # (C, k*k, H_out, W_out)
    return p.reshape(c * k * k, h_out * w_out), h_out, w_out


def _sam_flat_kernel(feat_ref, svk_ref, w_ref, o_ref, *, negative_slope):
    sv_feat = feat_ref[...] * svk_ref[...]
    out = jnp.dot(w_ref[...], sv_feat, preferred_element_type=jnp.float32)
    o_ref[...] = _leaky_relu(out, negative_slope).astype(o_ref.dtype)


def _forward_unfused(x, svk, weight, kernel_size, stride, padding, negative_slope):
    c = x.shape[1]
    k = kernel_size
    o_minus_1 = weight.shape[0]
    out_channels = o_minus_1 + 1
    ckk = c * k * k
    dtype = x.dtype
    isz = jnp.dtype(dtype).itemsize

    input_feature, h_out, w_out = _unfold_nchw(x[0], k, stride, padding)   # (CKK, L)
    l_total = h_out * w_out
    sv_kernel = svk.reshape(ckk, l_total).astype(dtype)

    # ones row fuses the spatially varying channel sum into the matmul
    w_aug = jnp.concatenate(
        [jnp.ones((1, ckk), dtype=dtype),
         weight.reshape(o_minus_1, ckk).astype(dtype)], axis=0)            # (O, CKK)

    # Lane tile: as large as a conservative VMEM budget allows (cap raised to 16384).
    per_lane = (2 * 2 + 1) * ckk * isz + 3 * out_channels * 4
    budget = 24 * _MB
    l_min = _round_up(l_total, 128)
    tl = max(128, min(16384, (budget // per_lane) // 128 * 128, l_min))
    # keep >= 2 grid steps when possible so both v7x TensorCores get work
    if _round_up(l_total, tl) // tl < 2 and l_min >= 256:
        tl = max(128, min(tl, _round_up(l_min // 2, 128)))
    l_pad = _round_up(l_total, tl)
    if l_pad != l_total:
        input_feature = jnp.pad(input_feature, ((0, 0), (0, l_pad - l_total)))
        sv_kernel = jnp.pad(sv_kernel, ((0, 0), (0, l_pad - l_total)))

    need = (2 * 2 * ckk + 2 * out_channels) * tl * isz + out_channels * tl * 4 \
        + out_channels * ckk * isz
    vmem_limit = int(min(48 * _MB, max(32 * _MB, need + 8 * _MB)))
    cost = pl.CostEstimate(
        flops=2 * out_channels * ckk * l_total + ckk * l_total,
        transcendentals=0,
        bytes_accessed=(2 * ckk + out_channels) * l_total * isz)

    out_flat = pl.pallas_call(
        functools.partial(_sam_flat_kernel, negative_slope=negative_slope),
        out_shape=jax.ShapeDtypeStruct((out_channels, l_pad), dtype),
        grid_spec=pltpu.PrefetchScalarGridSpec(
            num_scalar_prefetch=0,
            grid=(l_pad // tl,),
            in_specs=[
                pl.BlockSpec((ckk, tl), lambda i: (0, i)),
                pl.BlockSpec((ckk, tl), lambda i: (0, i)),
                pl.BlockSpec((out_channels, ckk), lambda i: (0, 0)),
            ],
            out_specs=pl.BlockSpec((out_channels, tl), lambda i: (0, i)),
        ),
        compiler_params=pltpu.CompilerParams(
            dimension_semantics=("parallel",),
            vmem_limit_bytes=vmem_limit),
        cost_estimate=cost,
    )(input_feature, sv_kernel, w_aug)

    return out_flat[:, :l_total].reshape(1, out_channels, h_out, w_out)


# ---------------------------------------------------------------------------
# Public forward
# ---------------------------------------------------------------------------

@functools.partial(jax.jit, static_argnames=("kernel_size", "stride", "padding",
                                              "negative_slope"))
def spatially_adaptive_forward(x, sv_kernel_feature, weight,
                               kernel_size=3, stride=1, padding=1,
                               negative_slope=0.2):
    """
    x                 : (1, C, H, W)
    sv_kernel_feature : (1, C*k*k, H, W)
    weight            : (output_channels - 1, C, k, k)
    returns           : (1, output_channels, H_out, W_out)
    """
    assert x.shape[0] == 1 and sv_kernel_feature.shape[0] == 1, "module contract: batch == 1"

    # torch stride-mismatch padding branch (no-op for stride=1, matched sizes)
    if (sv_kernel_feature.shape[-1] * stride != x.shape[-1]
            or sv_kernel_feature.shape[-2] * stride != x.shape[-2]):
        dy = sv_kernel_feature.shape[-2] % stride
        dx = sv_kernel_feature.shape[-1] % stride
        sv_kernel_feature = jnp.pad(
            sv_kernel_feature,
            ((0, 0), (0, 0), (dy // 2, dy - dy // 2), (dx // 2, dx - dx // 2)))
        dy = x.shape[-2] % stride
        dx = x.shape[-1] % stride
        x = jnp.pad(x, ((0, 0), (0, 0), (dy // 2, dy - dy // 2), (dx // 2, dx - dx // 2)))

    c = x.shape[1]
    k = kernel_size
    p = padding
    h, w = x.shape[2], x.shape[3]
    ckk = c * k * k
    out_channels = weight.shape[0] + 1
    isz = jnp.dtype(x.dtype).itemsize

    if stride == 1:
        h_out = h + 2 * p - k + 1
        w_out = w + 2 * p - k + 1
        sv_numel = (sv_kernel_feature.shape[1] * sv_kernel_feature.shape[2]
                    * sv_kernel_feature.shape[3])
        if h_out >= 1 and w_out >= 1 and sv_numel == ckk * h_out * w_out:
            per_elem = 2 * ckk * isz + 2 * out_channels * isz + (out_channels + 3) * 4
            tile_h = _pick_row_tile(h_out, w_out, per_elem, 18 * _MB)
            if tile_h is not None:
                return _forward_fused(x, sv_kernel_feature, weight,
                                      kernel_size, p, negative_slope, tile_h)
    # generic fallback (materialized unfold + flat matmul kernel)
    return _forward_unfused(x, sv_kernel_feature, weight,
                            kernel_size, stride, p, negative_slope)


# ---------------------------------------------------------------------------
# Pure-JAX reference + self-test
# ---------------------------------------------------------------------------

def _reference_jax(x, sv_kernel_feature, weight, kernel_size=3, stride=1, padding=1):
    c = x.shape[1]
    k = kernel_size
    o_minus_1 = weight.shape[0]
    input_feature, h_out, w_out = _unfold_nchw(x[0], k, stride, padding)
    sv_kernel = sv_kernel_feature.reshape(c * k * k, h_out * w_out)
    sv_feature = input_feature * sv_kernel
    sv_output = jnp.sum(sv_feature, axis=0, keepdims=True)
    si_kernel = weight.reshape(o_minus_1, c * k * k)
    sa_output = si_kernel @ sv_feature
    out = jnp.concatenate([sv_output, sa_output], axis=0)
    out = _leaky_relu(out, 0.2)          # module default: torch.nn.LeakyReLU(0.2)
    return out.reshape(1, o_minus_1 + 1, h_out, w_out)


if __name__ == "__main__":
    input_channels = 4
    output_channels = 4
    kernel_size = 3
    stride = 1
    padding = 1

    key = jax.random.PRNGKey(0)

    # 16x16 exercises the multi-tile (grid=2, megacore) path; 20x20 the single-tile path.
    for (H, W) in [(16, 16), (20, 20)]:
        key, k_x, k_sv, k_w = jax.random.split(key, 4)
        x = jax.random.normal(k_x, (1, input_channels, H, W), dtype=jnp.float32)
        sv_kernel_feature = jax.random.normal(
            k_sv, (1, input_channels * kernel_size * kernel_size, H, W), dtype=jnp.float32)
        weight = 0.1 * jax.random.normal(
            k_w, (output_channels - 1, input_channels, kernel_size, kernel_size),
            dtype=jnp.float32)

        out = spatially_adaptive_forward(
            x, sv_kernel_feature, weight,
            kernel_size=kernel_size, stride=stride, padding=padding)
        out = jax.block_until_ready(out)

        ref = _reference_jax(x, sv_kernel_feature, weight,
                             kernel_size=kernel_size, stride=stride, padding=padding)
        assert out.shape == (1, output_channels, H, W), out.shape
        assert jnp.allclose(out, ref, atol=1e-4, rtol=1e-4), f"mismatch vs reference at {(H, W)}"

    print("KERNEL_OK")
</pallas_src>

<mosaic_0001>
module attributes {stable_mosaic.version = 11 : i64} {
  func.func @_sam_fused_kernel(%arg0: i32, %arg1: memref<36x8x16xf32, #tpu.memory_space<vmem>>, %arg2: memref<3x36xf32, #tpu.memory_space<smem>>, %arg3: memref<4x18x18xf32, #tpu.memory_space<any>>, %arg4: memref<4x8x16xf32, #tpu.memory_space<vmem>>, %arg5: memref<4x10x18xf32, #tpu.memory_space<vmem>>, %arg6: memref<1x!tpu.dma_semaphore, #tpu.memory_space<semaphore_mem>>) attributes {dimension_semantics = [#tpu.dimension_semantics<parallel>], iteration_bounds = array<i64: 2>, scalar_prefetch = 0 : i64, scratch_operands = 2 : i64, tpu.core_type = #tpu.core_type<tc>, window_params = [{transform_indices = @transform_0, window_bounds = array<i64: 36, 8, 16>}, {transform_indices = @transform_1, window_bounds = array<i64: 3, 36>}, {}, {transform_indices = @transform_3, window_bounds = array<i64: 4, 8, 16>}]} {
    %c8_i32 = arith.constant 8 : i32
    %0 = arith.muli %arg0, %c8_i32 : i32
    %c0_i32 = arith.constant 0 : i32
    %c0_i32_0 = arith.constant 0 : i32
    %c0_i32_1 = arith.constant 0 : i32
    %1 = tpu.memref_slice %arg3[%c0_i32_0, %0, %c0_i32_1] : memref<4x18x18xf32, #tpu.memory_space<any>> -> memref<4x10x18xf32, #tpu.memory_space<any>>
    %2 = tpu.memref_slice %arg6[%c0_i32] : memref<1x!tpu.dma_semaphore, #tpu.memory_space<semaphore_mem>> -> memref<1x!tpu.dma_semaphore, #tpu.memory_space<semaphore_mem>>
    %3 = tpu.memref_squeeze %2 : memref<1x!tpu.dma_semaphore, #tpu.memory_space<semaphore_mem>> -> memref<!tpu.dma_semaphore, #tpu.memory_space<semaphore_mem>>
    tpu.enqueue_dma source(%1 : memref<4x10x18xf32, #tpu.memory_space<any>>) target(%arg5 : memref<4x10x18xf32, #tpu.memory_space<vmem>>) target_semaphore(%3 : memref<!tpu.dma_semaphore, #tpu.memory_space<semaphore_mem>>)
    %c0_i32_2 = arith.constant 0 : i32
    %c0_i32_3 = arith.constant 0 : i32
    %c0_i32_4 = arith.constant 0 : i32
    %4 = tpu.memref_slice %arg3[%c0_i32_3, %0, %c0_i32_4] : memref<4x18x18xf32, #tpu.memory_space<any>> -> memref<4x10x18xf32, #tpu.memory_space<any>>
    %5 = tpu.memref_slice %arg6[%c0_i32_2] : memref<1x!tpu.dma_semaphore, #tpu.memory_space<semaphore_mem>> -> memref<1x!tpu.dma_semaphore, #tpu.memory_space<semaphore_mem>>
    %6 = tpu.memref_squeeze %5 : memref<1x!tpu.dma_semaphore, #tpu.memory_space<semaphore_mem>> -> memref<!tpu.dma_semaphore, #tpu.memory_space<semaphore_mem>>
    tpu.wait_dma2 semaphore(%6 : memref<!tpu.dma_semaphore, #tpu.memory_space<semaphore_mem>>) src(%4 : memref<4x10x18xf32, #tpu.memory_space<any>>) dst(%arg5 : memref<4x10x18xf32, #tpu.memory_space<vmem>>)
    %c0 = arith.constant 0 : index
    %c0_5 = arith.constant 0 : index
    %c0_6 = arith.constant 0 : index
    %7 = vector.load %arg5[%c0, %c0_5, %c0_6] : memref<4x10x18xf32, #tpu.memory_space<vmem>>, vector<1x8x16xf32>
    %8 = vector.shape_cast %7 : vector<1x8x16xf32> to vector<8x16xf32>
    %c0_7 = arith.constant 0 : index
    %c0_8 = arith.constant 0 : index
    %c0_9 = arith.constant 0 : index
    %9 = vector.load %arg1[%c0_7, %c0_8, %c0_9] : memref<36x8x16xf32, #tpu.memory_space<vmem>>, vector<1x8x16xf32>
    %10 = vector.shape_cast %9 : vector<1x8x16xf32> to vector<8x16xf32>
    %11 = arith.mulf %8, %10 : vector<8x16xf32>
    %c0_10 = arith.constant 0 : index
    %c0_11 = arith.constant 0 : index
    %12 = memref.load %arg2[%c0_10, %c0_11] : memref<3x36xf32, #tpu.memory_space<smem>>
    %13 = vector.broadcast %12 : f32 to vector<8x16xf32>
    %14 = arith.mulf %13, %11 : vector<8x16xf32>
    %c1 = arith.constant 1 : index
    %c0_12 = arith.constant 0 : index
    %15 = memref.load %arg2[%c1, %c0_12] : memref<3x36xf32, #tpu.memory_space<smem>>
    %16 = vector.broadcast %15 : f32 to vector<8x16xf32>
    %17 = arith.mulf %16, %11 : vector<8x16xf32>
    %c2 = arith.constant 2 : index
    %c0_13 = arith.constant 0 : index
    %18 = memref.load %arg2[%c2, %c0_13] : memref<3x36xf32, #tpu.memory_space<smem>>
    %19 = vector.broadcast %18 : f32 to vector<8x16xf32>
    %20 = arith.mulf %19, %11 : vector<8x16xf32>
    %c0_14 = arith.constant 0 : index
    %c0_15 = arith.constant 0 : index
    %c1_16 = arith.constant 1 : index
    %21 = vector.load %arg5[%c0_14, %c0_15, %c1_16] : memref<4x10x18xf32, #tpu.memory_space<vmem>>, vector<1x8x16xf32>
    %22 = vector.shape_cast %21 : vector<1x8x16xf32> to vector<8x16xf32>
    %c1_17 = arith.constant 1 : index
    %c0_18 = arith.constant 0 : index
    %c0_19 = arith.constant 0 : index
    %23 = vector.load %arg1[%c1_17, %c0_18, %c0_19] : memref<36x8x16xf32, #tpu.memory_space<vmem>>, vector<1x8x16xf32>
    %24 = vector.shape_cast %23 : vector<1x8x16xf32> to vector<8x16xf32>
    %25 = arith.mulf %22, %24 : vector<8x16xf32>
    %26 = arith.addf %11, %25 : vector<8x16xf32>
    %c0_20 = arith.constant 0 : index
    %c1_21 = arith.constant 1 : index
    %27 = memref.load %arg2[%c0_20, %c1_21] : memref<3x36xf32, #tpu.memory_space<smem>>
    %28 = vector.broadcast %27 : f32 to vector<8x16xf32>
    %29 = arith.mulf %28, %25 : vector<8x16xf32>
    %30 = arith.addf %14, %29 : vector<8x16xf32>
    %c1_22 = arith.constant 1 : index
    %c1_23 = arith.constant 1 : index
    %31 = memref.load %arg2[%c1_22, %c1_23] : memref<3x36xf32, #tpu.memory_space<smem>>
    %32 = vector.broadcast %31 : f32 to vector<8x16xf32>
    %33 = arith.mulf %32, %25 : vector<8x16xf32>
    %34 = arith.addf %17, %33 : vector<8x16xf32>
    %c2_24 = arith.constant 2 : index
    %c1_25 = arith.constant 1 : index
    %35 = memref.load %arg2[%c2_24, %c1_25] : memref<3x36xf32, #tpu.memory_space<smem>>
    %36 = vector.broadcast %35 : f32 to vector<8x16xf32>
    %37 = arith.mulf %36, %25 : vector<8x16xf32>
    %38 = arith.addf %20, %37 : vector<8x16xf32>
    %c0_26 = arith.constant 0 : index
    %c0_27 = arith.constant 0 : index
    %c2_28 = arith.constant 2 : index
    %39 = vector.load %arg5[%c0_26, %c0_27, %c2_28] : memref<4x10x18xf32, #tpu.memory_space<vmem>>, vector<1x8x16xf32>
    %40 = vector.shape_cast %39 : vector<1x8x16xf32> to vector<8x16xf32>
    %c2_29 = arith.constant 2 : index
    %c0_30 = arith.constant 0 : index
    %c0_31 = arith.constant 0 : index
    %41 = vector.load %arg1[%c2_29, %c0_30, %c0_31] : memref<36x8x16xf32, #tpu.memory_space<vmem>>, vector<1x8x16xf32>
    %42 = vector.shape_cast %41 : vector<1x8x16xf32> to vector<8x16xf32>
    %43 = arith.mulf %40, %42 : vector<8x16xf32>
    %44 = arith.addf %26, %43 : vector<8x16xf32>
    %c0_32 = arith.constant 0 : index
    %c2_33 = arith.constant 2 : index
    %45 = memref.load %arg2[%c0_32, %c2_33] : memref<3x36xf32, #tpu.memory_space<smem>>
    %46 = vector.broadcast %45 : f32 to vector<8x16xf32>
    %47 = arith.mulf %46, %43 : vector<8x16xf32>
    %48 = arith.addf %30, %47 : vector<8x16xf32>
    %c1_34 = arith.constant 1 : index
    %c2_35 = arith.constant 2 : index
    %49 = memref.load %arg2[%c1_34, %c2_35] : memref<3x36xf32, #tpu.memory_space<smem>>
    %50 = vector.broadcast %49 : f32 to vector<8x16xf32>
    %51 = arith.mulf %50, %43 : vector<8x16xf32>
    %52 = arith.addf %34, %51 : vector<8x16xf32>
    %c2_36 = arith.constant 2 : index
    %c2_37 = arith.constant 2 : index
    %53 = memref.load %arg2[%c2_36, %c2_37] : memref<3x36xf32, #tpu.memory_space<smem>>
    %54 = vector.broadcast %53 : f32 to vector<8x16xf32>
    %55 = arith.mulf %54, %43 : vector<8x16xf32>
    %56 = arith.addf %38, %55 : vector<8x16xf32>
    %c0_38 = arith.constant 0 : index
    %c1_39 = arith.constant 1 : index
    %c0_40 = arith.constant 0 : index
    %57 = vector.load %arg5[%c0_38, %c1_39, %c0_40] : memref<4x10x18xf32, #tpu.memory_space<vmem>>, vector<1x8x16xf32>
    %58 = vector.shape_cast %57 : vector<1x8x16xf32> to vector<8x16xf32>
    %c3 = arith.constant 3 : index
    %c0_41 = arith.constant 0 : index
    %c0_42 = arith.constant 0 : index
    %59 = vector.load %arg1[%c3, %c0_41, %c0_42] : memref<36x8x16xf32, #tpu.memory_space<vmem>>, vector<1x8x16xf32>
    %60 = vector.shape_cast %59 : vector<1x8x16xf32> to vector<8x16xf32>
    %61 = arith.mulf %58, %60 : vector<8x16xf32>
    %62 = arith.addf %44, %61 : vector<8x16xf32>
    %c0_43 = arith.constant 0 : index
    %c3_44 = arith.constant 3 : index
    %63 = memref.load %arg2[%c0_43, %c3_44] : memref<3x36xf32, #tpu.memory_space<smem>>
    %64 = vector.broadcast %63 : f32 to vector<8x16xf32>
    %65 = arith.mulf %64, %61 : vector<8x16xf32>
    %66 = arith.addf %48, %65 : vector<8x16xf32>
    %c1_45 = arith.constant 1 : index
    %c3_46 = arith.constant 3 : index
    %67 = memref.load %arg2[%c1_45, %c3_46] : memref<3x36xf32, #tpu.memory_space<smem>>
    %68 = vector.broadcast %67 : f32 to vector<8x16xf32>
    %69 = arith.mulf %68, %61 : vector<8x16xf32>
    %70 = arith.addf %52, %69 : vector<8x16xf32>
    %c2_47 = arith.constant 2 : index
    %c3_48 = arith.constant 3 : index
    %71 = memref.load %arg2[%c2_47, %c3_48] : memref<3x36xf32, #tpu.memory_space<smem>>
    %72 = vector.broadcast %71 : f32 to vector<8x16xf32>
    %73 = arith.mulf %72, %61 : vector<8x16xf32>
    %74 = arith.addf %56, %73 : vector<8x16xf32>
    %c0_49 = arith.constant 0 : index
    %c1_50 = arith.constant 1 : index
    %c1_51 = arith.constant 1 : index
    %75 = vector.load %arg5[%c0_49, %c1_50, %c1_51] : memref<4x10x18xf32, #tpu.memory_space<vmem>>, vector<1x8x16xf32>
    %76 = vector.shape_cast %75 : vector<1x8x16xf32> to vector<8x16xf32>
    %c4 = arith.constant 4 : index
    %c0_52 = arith.constant 0 : index
    %c0_53 = arith.constant 0 : index
    %77 = vector.load %arg1[%c4, %c0_52, %c0_53] : memref<36x8x16xf32, #tpu.memory_space<vmem>>, vector<1x8x16xf32>
    %78 = vector.shape_cast %77 : vector<1x8x16xf32> to vector<8x16xf32>
    %79 = arith.mulf %76, %78 : vector<8x16xf32>
    %80 = arith.addf %62, %79 : vector<8x16xf32>
    %c0_54 = arith.constant 0 : index
    %c4_55 = arith.constant 4 : index
    %81 = memref.load %arg2[%c0_54, %c4_55] : memref<3x36xf32, #tpu.memory_space<smem>>
    %82 = vector.broadcast %81 : f32 to vector<8x16xf32>
    %83 = arith.mulf %82, %79 : vector<8x16xf32>
    %84 = arith.addf %66, %83 : vector<8x16xf32>
    %c1_56 = arith.constant 1 : index
    %c4_57 = arith.constant 4 : index
    %85 = memref.load %arg2[%c1_56, %c4_57] : memref<3x36xf32, #tpu.memory_space<smem>>
    %86 = vector.broadcast %85 : f32 to vector<8x16xf32>
    %87 = arith.mulf %86, %79 : vector<8x16xf32>
    %88 = arith.addf %70, %87 : vector<8x16xf32>
    %c2_58 = arith.constant 2 : index
    %c4_59 = arith.constant 4 : index
    %89 = memref.load %arg2[%c2_58, %c4_59] : memref<3x36xf32, #tpu.memory_space<smem>>
    %90 = vector.broadcast %89 : f32 to vector<8x16xf32>
    %91 = arith.mulf %90, %79 : vector<8x16xf32>
    %92 = arith.addf %74, %91 : vector<8x16xf32>
    %c0_60 = arith.constant 0 : index
    %c1_61 = arith.constant 1 : index
    %c2_62 = arith.constant 2 : index
    %93 = vector.load %arg5[%c0_60, %c1_61, %c2_62] : memref<4x10x18xf32, #tpu.memory_space<vmem>>, vector<1x8x16xf32>
    %94 = vector.shape_cast %93 : vector<1x8x16xf32> to vector<8x16xf32>
    %c5 = arith.constant 5 : index
    %c0_63 = arith.constant 0 : index
    %c0_64 = arith.constant 0 : index
    %95 = vector.load %arg1[%c5, %c0_63, %c0_64] : memref<36x8x16xf32, #tpu.memory_space<vmem>>, vector<1x8x16xf32>
    %96 = vector.shape_cast %95 : vector<1x8x16xf32> to vector<8x16xf32>
    %97 = arith.mulf %94, %96 : vector<8x16xf32>
    %98 = arith.addf %80, %97 : vector<8x16xf32>
    %c0_65 = arith.constant 0 : index
    %c5_66 = arith.constant 5 : index
    %99 = memref.load %arg2[%c0_65, %c5_66] : memref<3x36xf32, #tpu.memory_space<smem>>
    %100 = vector.broadcast %99 : f32 to vector<8x16xf32>
    %101 = arith.mulf %100, %97 : vector<8x16xf32>
    %102 = arith.addf %84, %101 : vector<8x16xf32>
    %c1_67 = arith.constant 1 : index
    %c5_68 = arith.constant 5 : index
    %103 = memref.load %arg2[%c1_67, %c5_68] : memref<3x36xf32, #tpu.memory_space<smem>>
    %104 = vector.broadcast %103 : f32 to vector<8x16xf32>
    %105 = arith.mulf %104, %97 : vector<8x16xf32>
    %106 = arith.addf %88, %105 : vector<8x16xf32>
    %c2_69 = arith.constant 2 : index
    %c5_70 = arith.constant 5 : index
    %107 = memref.load %arg2[%c2_69, %c5_70] : memref<3x36xf32, #tpu.memory_space<smem>>
    %108 = vector.broadcast %107 : f32 to vector<8x16xf32>
    %109 = arith.mulf %108, %97 : vector<8x16xf32>
    %110 = arith.addf %92, %109 : vector<8x16xf32>
    %c0_71 = arith.constant 0 : index
    %c2_72 = arith.constant 2 : index
    %c0_73 = arith.constant 0 : index
    %111 = vector.load %arg5[%c0_71, %c2_72, %c0_73] : memref<4x10x18xf32, #tpu.memory_space<vmem>>, vector<1x8x16xf32>
    %112 = vector.shape_cast %111 : vector<1x8x16xf32> to vector<8x16xf32>
    %c6 = arith.constant 6 : index
    %c0_74 = arith.constant 0 : index
    %c0_75 = arith.constant 0 : index
    %113 = vector.load %arg1[%c6, %c0_74, %c0_75] : memref<36x8x16xf32, #tpu.memory_space<vmem>>, vector<1x8x16xf32>
    %114 = vector.shape_cast %113 : vector<1x8x16xf32> to vector<8x16xf32>
    %115 = arith.mulf %112, %114 : vector<8x16xf32>
    %116 = arith.addf %98, %115 : vector<8x16xf32>
    %c0_76 = arith.constant 0 : index
    %c6_77 = arith.constant 6 : index
    %117 = memref.load %arg2[%c0_76, %c6_77] : memref<3x36xf32, #tpu.memory_space<smem>>
    %118 = vector.broadcast %117 : f32 to vector<8x16xf32>
    %119 = arith.mulf %118, %115 : vector<8x16xf32>
    %120 = arith.addf %102, %119 : vector<8x16xf32>
    %c1_78 = arith.constant 1 : index
    %c6_79 = arith.constant 6 : index
    %121 = memref.load %arg2[%c1_78, %c6_79] : memref<3x36xf32, #tpu.memory_space<smem>>
    %122 = vector.broadcast %121 : f32 to vector<8x16xf32>
    %123 = arith.mulf %122, %115 : vector<8x16xf32>
    %124 = arith.addf %106, %123 : vector<8x16xf32>
    %c2_80 = arith.constant 2 : index
    %c6_81 = arith.constant 6 : index
    %125 = memref.load %arg2[%c2_80, %c6_81] : memref<3x36xf32, #tpu.memory_space<smem>>
    %126 = vector.broadcast %125 : f32 to vector<8x16xf32>
    %127 = arith.mulf %126, %115 : vector<8x16xf32>
    %128 = arith.addf %110, %127 : vector<8x16xf32>
    %c0_82 = arith.constant 0 : index
    %c2_83 = arith.constant 2 : index
    %c1_84 = arith.constant 1 : index
    %129 = vector.load %arg5[%c0_82, %c2_83, %c1_84] : memref<4x10x18xf32, #tpu.memory_space<vmem>>, vector<1x8x16xf32>
    %130 = vector.shape_cast %129 : vector<1x8x16xf32> to vector<8x16xf32>
    %c7 = arith.constant 7 : index
    %c0_85 = arith.constant 0 : index
    %c0_86 = arith.constant 0 : index
    %131 = vector.load %arg1[%c7, %c0_85, %c0_86] : memref<36x8x16xf32, #tpu.memory_space<vmem>>, vector<1x8x16xf32>
    %132 = vector.shape_cast %131 : vector<1x8x16xf32> to vector<8x16xf32>
    %133 = arith.mulf %130, %132 : vector<8x16xf32>
    %134 = arith.addf %116, %133 : vector<8x16xf32>
    %c0_87 = arith.constant 0 : index
    %c7_88 = arith.constant 7 : index
    %135 = memref.load %arg2[%c0_87, %c7_88] : memref<3x36xf32, #tpu.memory_space<smem>>
    %136 = vector.broadcast %135 : f32 to vector<8x16xf32>
    %137 = arith.mulf %136, %133 : vector<8x16xf32>
    %138 = arith.addf %120, %137 : vector<8x16xf32>
    %c1_89 = arith.constant 1 : index
    %c7_90 = arith.constant 7 : index
    %139 = memref.load %arg2[%c1_89, %c7_90] : memref<3x36xf32, #tpu.memory_space<smem>>
    %140 = vector.broadcast %139 : f32 to vector<8x16xf32>
    %141 = arith.mulf %140, %133 : vector<8x16xf32>
    %142 = arith.addf %124, %141 : vector<8x16xf32>
    %c2_91 = arith.constant 2 : index
    %c7_92 = arith.constant 7 : index
    %143 = memref.load %arg2[%c2_91, %c7_92] : memref<3x36xf32, #tpu.memory_space<smem>>
    %144 = vector.broadcast %143 : f32 to vector<8x16xf32>
    %145 = arith.mulf %144, %133 : vector<8x16xf32>
    %146 = arith.addf %128, %145 : vector<8x16xf32>
    %c0_93 = arith.constant 0 : index
    %c2_94 = arith.constant 2 : index
    %c2_95 = arith.constant 2 : index
    %147 = vector.load %arg5[%c0_93, %c2_94, %c2_95] : memref<4x10x18xf32, #tpu.memory_space<vmem>>, vector<1x8x16xf32>
    %148 = vector.shape_cast %147 : vector<1x8x16xf32> to vector<8x16xf32>
    %c8 = arith.constant 8 : index
    %c0_96 = arith.constant 0 : index
    %c0_97 = arith.constant 0 : index
    %149 = vector.load %arg1[%c8, %c0_96, %c0_97] : memref<36x8x16xf32, #tpu.memory_space<vmem>>, vector<1x8x16xf32>
    %150 = vector.shape_cast %149 : vector<1x8x16xf32> to vector<8x16xf32>
    %151 = arith.mulf %148, %150 : vector<8x16xf32>
    %152 = arith.addf %134, %151 : vector<8x16xf32>
    %c0_98 = arith.constant 0 : index
    %c8_99 = arith.constant 8 : index
    %153 = memref.load %arg2[%c0_98, %c8_99] : memref<3x36xf32, #tpu.memory_space<smem>>
    %154 = vector.broadcast %153 : f32 to vector<8x16xf32>
    %155 = arith.mulf %154, %151 : vector<8x16xf32>
    %156 = arith.addf %138, %155 : vector<8x16xf32>
    %c1_100 = arith.constant 1 : index
    %c8_101 = arith.constant 8 : index
    %157 = memref.load %arg2[%c1_100, %c8_101] : memref<3x36xf32, #tpu.memory_space<smem>>
    %158 = vector.broadcast %157 : f32 to vector<8x16xf32>
    %159 = arith.mulf %158, %151 : vector<8x16xf32>
    %160 = arith.addf %142, %159 : vector<8x16xf32>
    %c2_102 = arith.constant 2 : index
    %c8_103 = arith.constant 8 : index
    %161 = memref.load %arg2[%c2_102, %c8_103] : memref<3x36xf32, #tpu.memory_space<smem>>
    %162 = vector.broadcast %161 : f32 to vector<8x16xf32>
    %163 = arith.mulf %162, %151 : vector<8x16xf32>
    %164 = arith.addf %146, %163 : vector<8x16xf32>
    %c1_104 = arith.constant 1 : index
    %c0_105 = arith.constant 0 : index
    %c0_106 = arith.constant 0 : index
    %165 = vector.load %arg5[%c1_104, %c0_105, %c0_106] : memref<4x10x18xf32, #tpu.memory_space<vmem>>, vector<1x8x16xf32>
    %166 = vector.shape_cast %165 : vector<1x8x16xf32> to vector<8x16xf32>
    %c9 = arith.constant 9 : index
    %c0_107 = arith.constant 0 : index
    %c0_108 = arith.constant 0 : index
    %167 = vector.load %arg1[%c9, %c0_107, %c0_108] : memref<36x8x16xf32, #tpu.memory_space<vmem>>, vector<1x8x16xf32>
    %168 = vector.shape_cast %167 : vector<1x8x16xf32> to vector<8x16xf32>
    %169 = arith.mulf %166, %168 : vector<8x16xf32>
    %170 = arith.addf %152, %169 : vector<8x16xf32>
    %c0_109 = arith.constant 0 : index
    %c9_110 = arith.constant 9 : index
    %171 = memref.load %arg2[%c0_109, %c9_110] : memref<3x36xf32, #tpu.memory_space<smem>>
    %172 = vector.broadcast %171 : f32 to vector<8x16xf32>
    %173 = arith.mulf %172, %169 : vector<8x16xf32>
    %174 = arith.addf %156, %173 : vector<8x16xf32>
    %c1_111 = arith.constant 1 : index
    %c9_112 = arith.constant 9 : index
    %175 = memref.load %arg2[%c1_111, %c9_112] : memref<3x36xf32, #tpu.memory_space<smem>>
    %176 = vector.broadcast %175 : f32 to vector<8x16xf32>
    %177 = arith.mulf %176, %169 : vector<8x16xf32>
    %178 = arith.addf %160, %177 : vector<8x16xf32>
    %c2_113 = arith.constant 2 : index
    %c9_114 = arith.constant 9 : index
    %179 = memref.load %arg2[%c2_113, %c9_114] : memref<3x36xf32, #tpu.memory_space<smem>>
    %180 = vector.broadcast %179 : f32 to vector<8x16xf32>
    %181 = arith.mulf %180, %169 : vector<8x16xf32>
    %182 = arith.addf %164, %181 : vector<8x16xf32>
    %c1_115 = arith.constant 1 : index
    %c0_116 = arith.constant 0 : index
    %c1_117 = arith.constant 1 : index
    %183 = vector.load %arg5[%c1_115, %c0_116, %c1_117] : memref<4x10x18xf32, #tpu.memory_space<vmem>>, vector<1x8x16xf32>
    %184 = vector.shape_cast %183 : vector<1x8x16xf32> to vector<8x16xf32>
    %c10 = arith.constant 10 : index
    %c0_118 = arith.constant 0 : index
    %c0_119 = arith.constant 0 : index
    %185 = vector.load %arg1[%c10, %c0_118, %c0_119] : memref<36x8x16xf32, #tpu.memory_space<vmem>>, vector<1x8x16xf32>
    %186 = vector.shape_cast %185 : vector<1x8x16xf32> to vector<8x16xf32>
    %187 = arith.mulf %184, %186 : vector<8x16xf32>
    %188 = arith.addf %170, %187 : vector<8x16xf32>
    %c0_120 = arith.constant 0 : index
    %c10_121 = arith.constant 10 : index
    %189 = memref.load %arg2[%c0_120, %c10_121] : memref<3x36xf32, #tpu.memory_space<smem>>
    %190 = vector.broadcast %189 : f32 to vector<8x16xf32>
    %191 = arith.mulf %190, %187 : vector<8x16xf32>
    %192 = arith.addf %174, %191 : vector<8x16xf32>
    %c1_122 = arith.constant 1 : index
    %c10_123 = arith.constant 10 : index
    %193 = memref.load %arg2[%c1_122, %c10_123] : memref<3x36xf32, #tpu.memory_space<smem>>
    %194 = vector.broadcast %193 : f32 to vector<8x16xf32>
    %195 = arith.mulf %194, %187 : vector<8x16xf32>
    %196 = arith.addf %178, %195 : vector<8x16xf32>
    %c2_124 = arith.constant 2 : index
    %c10_125 = arith.constant 10 : index
    %197 = memref.load %arg2[%c2_124, %c10_125] : memref<3x36xf32, #tpu.memory_space<smem>>
    %198 = vector.broadcast %197 : f32 to vector<8x16xf32>
    %199 = arith.mulf %198, %187 : vector<8x16xf32>
    %200 = arith.addf %182, %199 : vector<8x16xf32>
    %c1_126 = arith.constant 1 : index
    %c0_127 = arith.constant 0 : index
    %c2_128 = arith.constant 2 : index
    %201 = vector.load %arg5[%c1_126, %c0_127, %c2_128] : memref<4x10x18xf32, #tpu.memory_space<vmem>>, vector<1x8x16xf32>
    %202 = vector.shape_cast %201 : vector<1x8x16xf32> to vector<8x16xf32>
    %c11 = arith.constant 11 : index
    %c0_129 = arith.constant 0 : index
    %c0_130 = arith.constant 0 : index
    %203 = vector.load %arg1[%c11, %c0_129, %c0_130] : memref<36x8x16xf32, #tpu.memory_space<vmem>>, vector<1x8x16xf32>
    %204 = vector.shape_cast %203 : vector<1x8x16xf32> to vector<8x16xf32>
    %205 = arith.mulf %202, %204 : vector<8x16xf32>
    %206 = arith.addf %188, %205 : vector<8x16xf32>
    %c0_131 = arith.constant 0 : index
    %c11_132 = arith.constant 11 : index
    %207 = memref.load %arg2[%c0_131, %c11_132] : memref<3x36xf32, #tpu.memory_space<smem>>
    %208 = vector.broadcast %207 : f32 to vector<8x16xf32>
    %209 = arith.mulf %208, %205 : vector<8x16xf32>
    %210 = arith.addf %192, %209 : vector<8x16xf32>
    %c1_133 = arith.constant 1 : index
    %c11_134 = arith.constant 11 : index
    %211 = memref.load %arg2[%c1_133, %c11_134] : memref<3x36xf32, #tpu.memory_space<smem>>
    %212 = vector.broadcast %211 : f32 to vector<8x16xf32>
    %213 = arith.mulf %212, %205 : vector<8x16xf32>
    %214 = arith.addf %196, %213 : vector<8x16xf32>
    %c2_135 = arith.constant 2 : index
    %c11_136 = arith.constant 11 : index
    %215 = memref.load %arg2[%c2_135, %c11_136] : memref<3x36xf32, #tpu.memory_space<smem>>
    %216 = vector.broadcast %215 : f32 to vector<8x16xf32>
    %217 = arith.mulf %216, %205 : vector<8x16xf32>
    %218 = arith.addf %200, %217 : vector<8x16xf32>
    %c1_137 = arith.constant 1 : index
    %c1_138 = arith.constant 1 : index
    %c0_139 = arith.constant 0 : index
    %219 = vector.load %arg5[%c1_137, %c1_138, %c0_139] : memref<4x10x18xf32, #tpu.memory_space<vmem>>, vector<1x8x16xf32>
    %220 = vector.shape_cast %219 : vector<1x8x16xf32> to vector<8x16xf32>
    %c12 = arith.constant 12 : index
    %c0_140 = arith.constant 0 : index
    %c0_141 = arith.constant 0 : index
    %221 = vector.load %arg1[%c12, %c0_140, %c0_141] : memref<36x8x16xf32, #tpu.memory_space<vmem>>, vector<1x8x16xf32>
    %222 = vector.shape_cast %221 : vector<1x8x16xf32> to vector<8x16xf32>
    %223 = arith.mulf %220, %222 : vector<8x16xf32>
    %224 = arith.addf %206, %223 : vector<8x16xf32>
    %c0_142 = arith.constant 0 : index
    %c12_143 = arith.constant 12 : index
    %225 = memref.load %arg2[%c0_142, %c12_143] : memref<3x36xf32, #tpu.memory_space<smem>>
    %226 = vector.broadcast %225 : f32 to vector<8x16xf32>
    %227 = arith.mulf %226, %223 : vector<8x16xf32>
    %228 = arith.addf %210, %227 : vector<8x16xf32>
    %c1_144 = arith.constant 1 : index
    %c12_145 = arith.constant 12 : index
    %229 = memref.load %arg2[%c1_144, %c12_145] : memref<3x36xf32, #tpu.memory_space<smem>>
    %230 = vector.broadcast %229 : f32 to vector<8x16xf32>
    %231 = arith.mulf %230, %223 : vector<8x16xf32>
    %232 = arith.addf %214, %231 : vector<8x16xf32>
    %c2_146 = arith.constant 2 : index
    %c12_147 = arith.constant 12 : index
    %233 = memref.load %arg2[%c2_146, %c12_147] : memref<3x36xf32, #tpu.memory_space<smem>>
    %234 = vector.broadcast %233 : f32 to vector<8x16xf32>
    %235 = arith.mulf %234, %223 : vector<8x16xf32>
    %236 = arith.addf %218, %235 : vector<8x16xf32>
    %c1_148 = arith.constant 1 : index
    %c1_149 = arith.constant 1 : index
    %c1_150 = arith.constant 1 : index
    %237 = vector.load %arg5[%c1_148, %c1_149, %c1_150] : memref<4x10x18xf32, #tpu.memory_space<vmem>>, vector<1x8x16xf32>
    %238 = vector.shape_cast %237 : vector<1x8x16xf32> to vector<8x16xf32>
    %c13 = arith.constant 13 : index
    %c0_151 = arith.constant 0 : index
    %c0_152 = arith.constant 0 : index
    %239 = vector.load %arg1[%c13, %c0_151, %c0_152] : memref<36x8x16xf32, #tpu.memory_space<vmem>>, vector<1x8x16xf32>
    %240 = vector.shape_cast %239 : vector<1x8x16xf32> to vector<8x16xf32>
    %241 = arith.mulf %238, %240 : vector<8x16xf32>
    %242 = arith.addf %224, %241 : vector<8x16xf32>
    %c0_153 = arith.constant 0 : index
    %c13_154 = arith.constant 13 : index
    %243 = memref.load %arg2[%c0_153, %c13_154] : memref<3x36xf32, #tpu.memory_space<smem>>
    %244 = vector.broadcast %243 : f32 to vector<8x16xf32>
    %245 = arith.mulf %244, %241 : vector<8x16xf32>
    %246 = arith.addf %228, %245 : vector<8x16xf32>
    %c1_155 = arith.constant 1 : index
    %c13_156 = arith.constant 13 : index
    %247 = memref.load %arg2[%c1_155, %c13_156] : memref<3x36xf32, #tpu.memory_space<smem>>
    %248 = vector.broadcast %247 : f32 to vector<8x16xf32>
    %249 = arith.mulf %248, %241 : vector<8x16xf32>
    %250 = arith.addf %232, %249 : vector<8x16xf32>
    %c2_157 = arith.constant 2 : index
    %c13_158 = arith.constant 13 : index
    %251 = memref.load %arg2[%c2_157, %c13_158] : memref<3x36xf32, #tpu.memory_space<smem>>
    %252 = vector.broadcast %251 : f32 to vector<8x16xf32>
    %253 = arith.mulf %252, %241 : vector<8x16xf32>
    %254 = arith.addf %236, %253 : vector<8x16xf32>
    %c1_159 = arith.constant 1 : index
    %c1_160 = arith.constant 1 : index
    %c2_161 = arith.constant 2 : index
    %255 = vector.load %arg5[%c1_159, %c1_160, %c2_161] : memref<4x10x18xf32, #tpu.memory_space<vmem>>, vector<1x8x16xf32>
    %256 = vector.shape_cast %255 : vector<1x8x16xf32> to vector<8x16xf32>
    %c14 = arith.constant 14 : index
    %c0_162 = arith.constant 0 : index
    %c0_163 = arith.constant 0 : index
    %257 = vector.load %arg1[%c14, %c0_162, %c0_163] : memref<36x8x16xf32, #tpu.memory_space<vmem>>, vector<1x8x16xf32>
    %258 = vector.shape_cast %257 : vector<1x8x16xf32> to vector<8x16xf32>
    %259 = arith.mulf %256, %258 : vector<8x16xf32>
    %260 = arith.addf %242, %259 : vector<8x16xf32>
    %c0_164 = arith.constant 0 : index
    %c14_165 = arith.constant 14 : index
    %261 = memref.load %arg2[%c0_164, %c14_165] : memref<3x36xf32, #tpu.memory_space<smem>>
    %262 = vector.broadcast %261 : f32 to vector<8x16xf32>
    %263 = arith.mulf %262, %259 : vector<8x16xf32>
    %264 = arith.addf %246, %263 : vector<8x16xf32>
    %c1_166 = arith.constant 1 : index
    %c14_167 = arith.constant 14 : index
    %265 = memref.load %arg2[%c1_166, %c14_167] : memref<3x36xf32, #tpu.memory_space<smem>>
    %266 = vector.broadcast %265 : f32 to vector<8x16xf32>
    %267 = arith.mulf %266, %259 : vector<8x16xf32>
    %268 = arith.addf %250, %267 : vector<8x16xf32>
    %c2_168 = arith.constant 2 : index
    %c14_169 = arith.constant 14 : index
    %269 = memref.load %arg2[%c2_168, %c14_169] : memref<3x36xf32, #tpu.memory_space<smem>>
    %270 = vector.broadcast %269 : f32 to vector<8x16xf32>
    %271 = arith.mulf %270, %259 : vector<8x16xf32>
    %272 = arith.addf %254, %271 : vector<8x16xf32>
    %c1_170 = arith.constant 1 : index
    %c2_171 = arith.constant 2 : index
    %c0_172 = arith.constant 0 : index
    %273 = vector.load %arg5[%c1_170, %c2_171, %c0_172] : memref<4x10x18xf32, #tpu.memory_space<vmem>>, vector<1x8x16xf32>
    %274 = vector.shape_cast %273 : vector<1x8x16xf32> to vector<8x16xf32>
    %c15 = arith.constant 15 : index
    %c0_173 = arith.constant 0 : index
    %c0_174 = arith.constant 0 : index
    %275 = vector.load %arg1[%c15, %c0_173, %c0_174] : memref<36x8x16xf32, #tpu.memory_space<vmem>>, vector<1x8x16xf32>
    %276 = vector.shape_cast %275 : vector<1x8x16xf32> to vector<8x16xf32>
    %277 = arith.mulf %274, %276 : vector<8x16xf32>
    %278 = arith.addf %260, %277 : vector<8x16xf32>
    %c0_175 = arith.constant 0 : index
    %c15_176 = arith.constant 15 : index
    %279 = memref.load %arg2[%c0_175, %c15_176] : memref<3x36xf32, #tpu.memory_space<smem>>
    %280 = vector.broadcast %279 : f32 to vector<8x16xf32>
    %281 = arith.mulf %280, %277 : vector<8x16xf32>
    %282 = arith.addf %264, %281 : vector<8x16xf32>
    %c1_177 = arith.constant 1 : index
    %c15_178 = arith.constant 15 : index
    %283 = memref.load %arg2[%c1_177, %c15_178] : memref<3x36xf32, #tpu.memory_space<smem>>
    %284 = vector.broadcast %283 : f32 to vector<8x16xf32>
    %285 = arith.mulf %284, %277 : vector<8x16xf32>
    %286 = arith.addf %268, %285 : vector<8x16xf32>
    %c2_179 = arith.constant 2 : index
    %c15_180 = arith.constant 15 : index
    %287 = memref.load %arg2[%c2_179, %c15_180] : memref<3x36xf32, #tpu.memory_space<smem>>
    %288 = vector.broadcast %287 : f32 to vector<8x16xf32>
    %289 = arith.mulf %288, %277 : vector<8x16xf32>
    %290 = arith.addf %272, %289 : vector<8x16xf32>
    %c1_181 = arith.constant 1 : index
    %c2_182 = arith.constant 2 : index
    %c1_183 = arith.constant 1 : index
    %291 = vector.load %arg5[%c1_181, %c2_182, %c1_183] : memref<4x10x18xf32, #tpu.memory_space<vmem>>, vector<1x8x16xf32>
    %292 = vector.shape_cast %291 : vector<1x8x16xf32> to vector<8x16xf32>
    %c16 = arith.constant 16 : index
    %c0_184 = arith.constant 0 : index
    %c0_185 = arith.constant 0 : index
    %293 = vector.load %arg1[%c16, %c0_184, %c0_185] : memref<36x8x16xf32, #tpu.memory_space<vmem>>, vector<1x8x16xf32>
    %294 = vector.shape_cast %293 : vector<1x8x16xf32> to vector<8x16xf32>
    %295 = arith.mulf %292, %294 : vector<8x16xf32>
    %296 = arith.addf %278, %295 : vector<8x16xf32>
    %c0_186 = arith.constant 0 : index
    %c16_187 = arith.constant 16 : index
    %297 = memref.load %arg2[%c0_186, %c16_187] : memref<3x36xf32, #tpu.memory_space<smem>>
    %298 = vector.broadcast %297 : f32 to vector<8x16xf32>
    %299 = arith.mulf %298, %295 : vector<8x16xf32>
    %300 = arith.addf %282, %299 : vector<8x16xf32>
    %c1_188 = arith.constant 1 : index
    %c16_189 = arith.constant 16 : index
    %301 = memref.load %arg2[%c1_188, %c16_189] : memref<3x36xf32, #tpu.memory_space<smem>>
    %302 = vector.broadcast %301 : f32 to vector<8x16xf32>
    %303 = arith.mulf %302, %295 : vector<8x16xf32>
    %304 = arith.addf %286, %303 : vector<8x16xf32>
    %c2_190 = arith.constant 2 : index
    %c16_191 = arith.constant 16 : index
    %305 = memref.load %arg2[%c2_190, %c16_191] : memref<3x36xf32, #tpu.memory_space<smem>>
    %306 = vector.broadcast %305 : f32 to vector<8x16xf32>
    %307 = arith.mulf %306, %295 : vector<8x16xf32>
    %308 = arith.addf %290, %307 : vector<8x16xf32>
    %c1_192 = arith.constant 1 : index
    %c2_193 = arith.constant 2 : index
    %c2_194 = arith.constant 2 : index
    %309 = vector.load %arg5[%c1_192, %c2_193, %c2_194] : memref<4x10x18xf32, #tpu.memory_space<vmem>>, vector<1x8x16xf32>
    %310 = vector.shape_cast %309 : vector<1x8x16xf32> to vector<8x16xf32>
    %c17 = arith.constant 17 : index
    %c0_195 = arith.constant 0 : index
    %c0_196 = arith.constant 0 : index
    %311 = vector.load %arg1[%c17, %c0_195, %c0_196] : memref<36x8x16xf32, #tpu.memory_space<vmem>>, vector<1x8x16xf32>
    %312 = vector.shape_cast %311 : vector<1x8x16xf32> to vector<8x16xf32>
    %313 = arith.mulf %310, %312 : vector<8x16xf32>
    %314 = arith.addf %296, %313 : vector<8x16xf32>
    %c0_197 = arith.constant 0 : index
    %c17_198 = arith.constant 17 : index
    %315 = memref.load %arg2[%c0_197, %c17_198] : memref<3x36xf32, #tpu.memory_space<smem>>
    %316 = vector.broadcast %315 : f32 to vector<8x16xf32>
    %317 = arith.mulf %316, %313 : vector<8x16xf32>
    %318 = arith.addf %300, %317 : vector<8x16xf32>
    %c1_199 = arith.constant 1 : index
    %c17_200 = arith.constant 17 : index
    %319 = memref.load %arg2[%c1_199, %c17_200] : memref<3x36xf32, #tpu.memory_space<smem>>
    %320 = vector.broadcast %319 : f32 to vector<8x16xf32>
    %321 = arith.mulf %320, %313 : vector<8x16xf32>
    %322 = arith.addf %304, %321 : vector<8x16xf32>
    %c2_201 = arith.constant 2 : index
    %c17_202 = arith.constant 17 : index
    %323 = memref.load %arg2[%c2_201, %c17_202] : memref<3x36xf32, #tpu.memory_space<smem>>
    %324 = vector.broadcast %323 : f32 to vector<8x16xf32>
    %325 = arith.mulf %324, %313 : vector<8x16xf32>
    %326 = arith.addf %308, %325 : vector<8x16xf32>
    %c2_203 = arith.constant 2 : index
    %c0_204 = arith.constant 0 : index
    %c0_205 = arith.constant 0 : index
    %327 = vector.load %arg5[%c2_203, %c0_204, %c0_205] : memref<4x10x18xf32, #tpu.memory_space<vmem>>, vector<1x8x16xf32>
    %328 = vector.shape_cast %327 : vector<1x8x16xf32> to vector<8x16xf32>
    %c18 = arith.constant 18 : index
    %c0_206 = arith.constant 0 : index
    %c0_207 = arith.constant 0 : index
    %329 = vector.load %arg1[%c18, %c0_206, %c0_207] : memref<36x8x16xf32, #tpu.memory_space<vmem>>, vector<1x8x16xf32>
    %330 = vector.shape_cast %329 : vector<1x8x16xf32> to vector<8x16xf32>
    %331 = arith.mulf %328, %330 : vector<8x16xf32>
    %332 = arith.addf %314, %331 : vector<8x16xf32>
    %c0_208 = arith.constant 0 : index
    %c18_209 = arith.constant 18 : index
    %333 = memref.load %arg2[%c0_208, %c18_209] : memref<3x36xf32, #tpu.memory_space<smem>>
    %334 = vector.broadcast %333 : f32 to vector<8x16xf32>
    %335 = arith.mulf %334, %331 : vector<8x16xf32>
    %336 = arith.addf %318, %335 : vector<8x16xf32>
    %c1_210 = arith.constant 1 : index
    %c18_211 = arith.constant 18 : index
    %337 = memref.load %arg2[%c1_210, %c18_211] : memref<3x36xf32, #tpu.memory_space<smem>>
    %338 = vector.broadcast %337 : f32 to vector<8x16xf32>
    %339 = arith.mulf %338, %331 : vector<8x16xf32>
    %340 = arith.addf %322, %339 : vector<8x16xf32>
    %c2_212 = arith.constant 2 : index
    %c18_213 = arith.constant 18 : index
    %341 = memref.load %arg2[%c2_212, %c18_213] : memref<3x36xf32, #tpu.memory_space<smem>>
    %342 = vector.broadcast %341 : f32 to vector<8x16xf32>
    %343 = arith.mulf %342, %331 : vector<8x16xf32>
    %344 = arith.addf %326, %343 : vector<8x16xf32>
    %c2_214 = arith.constant 2 : index
    %c0_215 = arith.constant 0 : index
    %c1_216 = arith.constant 1 : index
    %345 = vector.load %arg5[%c2_214, %c0_215, %c1_216] : memref<4x10x18xf32, #tpu.memory_space<vmem>>, vector<1x8x16xf32>
    %346 = vector.shape_cast %345 : vector<1x8x16xf32> to vector<8x16xf32>
    %c19 = arith.constant 19 : index
    %c0_217 = arith.constant 0 : index
    %c0_218 = arith.constant 0 : index
    %347 = vector.load %arg1[%c19, %c0_217, %c0_218] : memref<36x8x16xf32, #tpu.memory_space<vmem>>, vector<1x8x16xf32>
    %348 = vector.shape_cast %347 : vector<1x8x16xf32> to vector<8x16xf32>
    %349 = arith.mulf %346, %348 : vector<8x16xf32>
    %350 = arith.addf %332, %349 : vector<8x16xf32>
    %c0_219 = arith.constant 0 : index
    %c19_220 = arith.constant 19 : index
    %351 = memref.load %arg2[%c0_219, %c19_220] : memref<3x36xf32, #tpu.memory_space<smem>>
    %352 = vector.broadcast %351 : f32 to vector<8x16xf32>
    %353 = arith.mulf %352, %349 : vector<8x16xf32>
    %354 = arith.addf %336, %353 : vector<8x16xf32>
    %c1_221 = arith.constant 1 : index
    %c19_222 = arith.constant 19 : index
    %355 = memref.load %arg2[%c1_221, %c19_222] : memref<3x36xf32, #tpu.memory_space<smem>>
    %356 = vector.broadcast %355 : f32 to vector<8x16xf32>
    %357 = arith.mulf %356, %349 : vector<8x16xf32>
    %358 = arith.addf %340, %357 : vector<8x16xf32>
    %c2_223 = arith.constant 2 : index
    %c19_224 = arith.constant 19 : index
    %359 = memref.load %arg2[%c2_223, %c19_224] : memref<3x36xf32, #tpu.memory_space<smem>>
    %360 = vector.broadcast %359 : f32 to vector<8x16xf32>
    %361 = arith.mulf %360, %349 : vector<8x16xf32>
    %362 = arith.addf %344, %361 : vector<8x16xf32>
    %c2_225 = arith.constant 2 : index
    %c0_226 = arith.constant 0 : index
    %c2_227 = arith.constant 2 : index
    %363 = vector.load %arg5[%c2_225, %c0_226, %c2_227] : memref<4x10x18xf32, #tpu.memory_space<vmem>>, vector<1x8x16xf32>
    %364 = vector.shape_cast %363 : vector<1x8x16xf32> to vector<8x16xf32>
    %c20 = arith.constant 20 : index
    %c0_228 = arith.constant 0 : index
    %c0_229 = arith.constant 0 : index
    %365 = vector.load %arg1[%c20, %c0_228, %c0_229] : memref<36x8x16xf32, #tpu.memory_space<vmem>>, vector<1x8x16xf32>
    %366 = vector.shape_cast %365 : vector<1x8x16xf32> to vector<8x16xf32>
    %367 = arith.mulf %364, %366 : vector<8x16xf32>
    %368 = arith.addf %350, %367 : vector<8x16xf32>
    %c0_230 = arith.constant 0 : index
    %c20_231 = arith.constant 20 : index
    %369 = memref.load %arg2[%c0_230, %c20_231] : memref<3x36xf32, #tpu.memory_space<smem>>
    %370 = vector.broadcast %369 : f32 to vector<8x16xf32>
    %371 = arith.mulf %370, %367 : vector<8x16xf32>
    %372 = arith.addf %354, %371 : vector<8x16xf32>
    %c1_232 = arith.constant 1 : index
    %c20_233 = arith.constant 20 : index
    %373 = memref.load %arg2[%c1_232, %c20_233] : memref<3x36xf32, #tpu.memory_space<smem>>
    %374 = vector.broadcast %373 : f32 to vector<8x16xf32>
    %375 = arith.mulf %374, %367 : vector<8x16xf32>
    %376 = arith.addf %358, %375 : vector<8x16xf32>
    %c2_234 = arith.constant 2 : index
    %c20_235 = arith.constant 20 : index
    %377 = memref.load %arg2[%c2_234, %c20_235] : memref<3x36xf32, #tpu.memory_space<smem>>
    %378 = vector.broadcast %377 : f32 to vector<8x16xf32>
    %379 = arith.mulf %378, %367 : vector<8x16xf32>
    %380 = arith.addf %362, %379 : vector<8x16xf32>
    %c2_236 = arith.constant 2 : index
    %c1_237 = arith.constant 1 : index
    %c0_238 = arith.constant 0 : index
    %381 = vector.load %arg5[%c2_236, %c1_237, %c0_238] : memref<4x10x18xf32, #tpu.memory_space<vmem>>, vector<1x8x16xf32>
    %382 = vector.shape_cast %381 : vector<1x8x16xf32> to vector<8x16xf32>
    %c21 = arith.constant 21 : index
    %c0_239 = arith.constant 0 : index
    %c0_240 = arith.constant 0 : index
    %383 = vector.load %arg1[%c21, %c0_239, %c0_240] : memref<36x8x16xf32, #tpu.memory_space<vmem>>, vector<1x8x16xf32>
    %384 = vector.shape_cast %383 : vector<1x8x16xf32> to vector<8x16xf32>
    %385 = arith.mulf %382, %384 : vector<8x16xf32>
    %386 = arith.addf %368, %385 : vector<8x16xf32>
    %c0_241 = arith.constant 0 : index
    %c21_242 = arith.constant 21 : index
    %387 = memref.load %arg2[%c0_241, %c21_242] : memref<3x36xf32, #tpu.memory_space<smem>>
    %388 = vector.broadcast %387 : f32 to vector<8x16xf32>
    %389 = arith.mulf %388, %385 : vector<8x16xf32>
    %390 = arith.addf %372, %389 : vector<8x16xf32>
    %c1_243 = arith.constant 1 : index
    %c21_244 = arith.constant 21 : index
    %391 = memref.load %arg2[%c1_243, %c21_244] : memref<3x36xf32, #tpu.memory_space<smem>>
    %392 = vector.broadcast %391 : f32 to vector<8x16xf32>
    %393 = arith.mulf %392, %385 : vector<8x16xf32>
    %394 = arith.addf %376, %393 : vector<8x16xf32>
    %c2_245 = arith.constant 2 : index
    %c21_246 = arith.constant 21 : index
    %395 = memref.load %arg2[%c2_245, %c21_246] : memref<3x36xf32, #tpu.memory_space<smem>>
    %396 = vector.broadcast %395 : f32 to vector<8x16xf32>
    %397 = arith.mulf %396, %385 : vector<8x16xf32>
    %398 = arith.addf %380, %397 : vector<8x16xf32>
    %c2_247 = arith.constant 2 : index
    %c1_248 = arith.constant 1 : index
    %c1_249 = arith.constant 1 : index
    %399 = vector.load %arg5[%c2_247, %c1_248, %c1_249] : memref<4x10x18xf32, #tpu.memory_space<vmem>>, vector<1x8x16xf32>
    %400 = vector.shape_cast %399 : vector<1x8x16xf32> to vector<8x16xf32>
    %c22 = arith.constant 22 : index
    %c0_250 = arith.constant 0 : index
    %c0_251 = arith.constant 0 : index
    %401 = vector.load %arg1[%c22, %c0_250, %c0_251] : memref<36x8x16xf32, #tpu.memory_space<vmem>>, vector<1x8x16xf32>
    %402 = vector.shape_cast %401 : vector<1x8x16xf32> to vector<8x16xf32>
    %403 = arith.mulf %400, %402 : vector<8x16xf32>
    %404 = arith.addf %386, %403 : vector<8x16xf32>
    %c0_252 = arith.constant 0 : index
    %c22_253 = arith.constant 22 : index
    %405 = memref.load %arg2[%c0_252, %c22_253] : memref<3x36xf32, #tpu.memory_space<smem>>
    %406 = vector.broadcast %405 : f32 to vector<8x16xf32>
    %407 = arith.mulf %406, %403 : vector<8x16xf32>
    %408 = arith.addf %390, %407 : vector<8x16xf32>
    %c1_254 = arith.constant 1 : index
    %c22_255 = arith.constant 22 : index
    %409 = memref.load %arg2[%c1_254, %c22_255] : memref<3x36xf32, #tpu.memory_space<smem>>
    %410 = vector.broadcast %409 : f32 to vector<8x16xf32>
    %411 = arith.mulf %410, %403 : vector<8x16xf32>
    %412 = arith.addf %394, %411 : vector<8x16xf32>
    %c2_256 = arith.constant 2 : index
    %c22_257 = arith.constant 22 : index
    %413 = memref.load %arg2[%c2_256, %c22_257] : memref<3x36xf32, #tpu.memory_space<smem>>
    %414 = vector.broadcast %413 : f32 to vector<8x16xf32>
    %415 = arith.mulf %414, %403 : vector<8x16xf32>
    %416 = arith.addf %398, %415 : vector<8x16xf32>
    %c2_258 = arith.constant 2 : index
    %c1_259 = arith.constant 1 : index
    %c2_260 = arith.constant 2 : index
    %417 = vector.load %arg5[%c2_258, %c1_259, %c2_260] : memref<4x10x18xf32, #tpu.memory_space<vmem>>, vector<1x8x16xf32>
    %418 = vector.shape_cast %417 : vector<1x8x16xf32> to vector<8x16xf32>
    %c23 = arith.constant 23 : index
    %c0_261 = arith.constant 0 : index
    %c0_262 = arith.constant 0 : index
    %419 = vector.load %arg1[%c23, %c0_261, %c0_262] : memref<36x8x16xf32, #tpu.memory_space<vmem>>, vector<1x8x16xf32>
    %420 = vector.shape_cast %419 : vector<1x8x16xf32> to vector<8x16xf32>
    %421 = arith.mulf %418, %420 : vector<8x16xf32>
    %422 = arith.addf %404, %421 : vector<8x16xf32>
    %c0_263 = arith.constant 0 : index
    %c23_264 = arith.constant 23 : index
    %423 = memref.load %arg2[%c0_263, %c23_264] : memref<3x36xf32, #tpu.memory_space<smem>>
    %424 = vector.broadcast %423 : f32 to vector<8x16xf32>
    %425 = arith.mulf %424, %421 : vector<8x16xf32>
    %426 = arith.addf %408, %425 : vector<8x16xf32>
    %c1_265 = arith.constant 1 : index
    %c23_266 = arith.constant 23 : index
    %427 = memref.load %arg2[%c1_265, %c23_266] : memref<3x36xf32, #tpu.memory_space<smem>>
    %428 = vector.broadcast %427 : f32 to vector<8x16xf32>
    %429 = arith.mulf %428, %421 : vector<8x16xf32>
    %430 = arith.addf %412, %429 : vector<8x16xf32>
    %c2_267 = arith.constant 2 : index
    %c23_268 = arith.constant 23 : index
    %431 = memref.load %arg2[%c2_267, %c23_268] : memref<3x36xf32, #tpu.memory_space<smem>>
    %432 = vector.broadcast %431 : f32 to vector<8x16xf32>
    %433 = arith.mulf %432, %421 : vector<8x16xf32>
    %434 = arith.addf %416, %433 : vector<8x16xf32>
    %c2_269 = arith.constant 2 : index
    %c2_270 = arith.constant 2 : index
    %c0_271 = arith.constant 0 : index
    %435 = vector.load %arg5[%c2_269, %c2_270, %c0_271] : memref<4x10x18xf32, #tpu.memory_space<vmem>>, vector<1x8x16xf32>
    %436 = vector.shape_cast %435 : vector<1x8x16xf32> to vector<8x16xf32>
    %c24 = arith.constant 24 : index
    %c0_272 = arith.constant 0 : index
    %c0_273 = arith.constant 0 : index
    %437 = vector.load %arg1[%c24, %c0_272, %c0_273] : memref<36x8x16xf32, #tpu.memory_space<vmem>>, vector<1x8x16xf32>
    %438 = vector.shape_cast %437 : vector<1x8x16xf32> to vector<8x16xf32>
    %439 = arith.mulf %436, %438 : vector<8x16xf32>
    %440 = arith.addf %422, %439 : vector<8x16xf32>
    %c0_274 = arith.constant 0 : index
    %c24_275 = arith.constant 24 : index
    %441 = memref.load %arg2[%c0_274, %c24_275] : memref<3x36xf32, #tpu.memory_space<smem>>
    %442 = vector.broadcast %441 : f32 to vector<8x16xf32>
    %443 = arith.mulf %442, %439 : vector<8x16xf32>
    %444 = arith.addf %426, %443 : vector<8x16xf32>
    %c1_276 = arith.constant 1 : index
    %c24_277 = arith.constant 24 : index
    %445 = memref.load %arg2[%c1_276, %c24_277] : memref<3x36xf32, #tpu.memory_space<smem>>
    %446 = vector.broadcast %445 : f32 to vector<8x16xf32>
    %447 = arith.mulf %446, %439 : vector<8x16xf32>
    %448 = arith.addf %430, %447 : vector<8x16xf32>
    %c2_278 = arith.constant 2 : index
    %c24_279 = arith.constant 24 : index
    %449 = memref.load %arg2[%c2_278, %c24_279] : memref<3x36xf32, #tpu.memory_space<smem>>
    %450 = vector.broadcast %449 : f32 to vector<8x16xf32>
    %451 = arith.mulf %450, %439 : vector<8x16xf32>
    %452 = arith.addf %434, %451 : vector<8x16xf32>
    %c2_280 = arith.constant 2 : index
    %c2_281 = arith.constant 2 : index
    %c1_282 = arith.constant 1 : index
    %453 = vector.load %arg5[%c2_280, %c2_281, %c1_282] : memref<4x10x18xf32, #tpu.memory_space<vmem>>, vector<1x8x16xf32>
    %454 = vector.shape_cast %453 : vector<1x8x16xf32> to vector<8x16xf32>
    %c25 = arith.constant 25 : index
    %c0_283 = arith.constant 0 : index
    %c0_284 = arith.constant 0 : index
    %455 = vector.load %arg1[%c25, %c0_283, %c0_284] : memref<36x8x16xf32, #tpu.memory_space<vmem>>, vector<1x8x16xf32>
    %456 = vector.shape_cast %455 : vector<1x8x16xf32> to vector<8x16xf32>
    %457 = arith.mulf %454, %456 : vector<8x16xf32>
    %458 = arith.addf %440, %457 : vector<8x16xf32>
    %c0_285 = arith.constant 0 : index
    %c25_286 = arith.constant 25 : index
    %459 = memref.load %arg2[%c0_285, %c25_286] : memref<3x36xf32, #tpu.memory_space<smem>>
    %460 = vector.broadcast %459 : f32 to vector<8x16xf32>
    %461 = arith.mulf %460, %457 : vector<8x16xf32>
    %462 = arith.addf %444, %461 : vector<8x16xf32>
    %c1_287 = arith.constant 1 : index
    %c25_288 = arith.constant 25 : index
    %463 = memref.load %arg2[%c1_287, %c25_288] : memref<3x36xf32, #tpu.memory_space<smem>>
    %464 = vector.broadcast %463 : f32 to vector<8x16xf32>
    %465 = arith.mulf %464, %457 : vector<8x16xf32>
    %466 = arith.addf %448, %465 : vector<8x16xf32>
    %c2_289 = arith.constant 2 : index
    %c25_290 = arith.constant 25 : index
    %467 = memref.load %arg2[%c2_289, %c25_290] : memref<3x36xf32, #tpu.memory_space<smem>>
    %468 = vector.broadcast %467 : f32 to vector<8x16xf32>
    %469 = arith.mulf %468, %457 : vector<8x16xf32>
    %470 = arith.addf %452, %469 : vector<8x16xf32>
    %c2_291 = arith.constant 2 : index
    %c2_292 = arith.constant 2 : index
    %c2_293 = arith.constant 2 : index
    %471 = vector.load %arg5[%c2_291, %c2_292, %c2_293] : memref<4x10x18xf32, #tpu.memory_space<vmem>>, vector<1x8x16xf32>
    %472 = vector.shape_cast %471 : vector<1x8x16xf32> to vector<8x16xf32>
    %c26 = arith.constant 26 : index
    %c0_294 = arith.constant 0 : index
    %c0_295 = arith.constant 0 : index
    %473 = vector.load %arg1[%c26, %c0_294, %c0_295] : memref<36x8x16xf32, #tpu.memory_space<vmem>>, vector<1x8x16xf32>
    %474 = vector.shape_cast %473 : vector<1x8x16xf32> to vector<8x16xf32>
    %475 = arith.mulf %472, %474 : vector<8x16xf32>
    %476 = arith.addf %458, %475 : vector<8x16xf32>
    %c0_296 = arith.constant 0 : index
    %c26_297 = arith.constant 26 : index
    %477 = memref.load %arg2[%c0_296, %c26_297] : memref<3x36xf32, #tpu.memory_space<smem>>
    %478 = vector.broadcast %477 : f32 to vector<8x16xf32>
    %479 = arith.mulf %478, %475 : vector<8x16xf32>
    %480 = arith.addf %462, %479 : vector<8x16xf32>
    %c1_298 = arith.constant 1 : index
    %c26_299 = arith.constant 26 : index
    %481 = memref.load %arg2[%c1_298, %c26_299] : memref<3x36xf32, #tpu.memory_space<smem>>
    %482 = vector.broadcast %481 : f32 to vector<8x16xf32>
    %483 = arith.mulf %482, %475 : vector<8x16xf32>
    %484 = arith.addf %466, %483 : vector<8x16xf32>
    %c2_300 = arith.constant 2 : index
    %c26_301 = arith.constant 26 : index
    %485 = memref.load %arg2[%c2_300, %c26_301] : memref<3x36xf32, #tpu.memory_space<smem>>
    %486 = vector.broadcast %485 : f32 to vector<8x16xf32>
    %487 = arith.mulf %486, %475 : vector<8x16xf32>
    %488 = arith.addf %470, %487 : vector<8x16xf32>
    %c3_302 = arith.constant 3 : index
    %c0_303 = arith.constant 0 : index
    %c0_304 = arith.constant 0 : index
    %489 = vector.load %arg5[%c3_302, %c0_303, %c0_304] : memref<4x10x18xf32, #tpu.memory_space<vmem>>, vector<1x8x16xf32>
    %490 = vector.shape_cast %489 : vector<1x8x16xf32> to vector<8x16xf32>
    %c27 = arith.constant 27 : index
    %c0_305 = arith.constant 0 : index
    %c0_306 = arith.constant 0 : index
    %491 = vector.load %arg1[%c27, %c0_305, %c0_306] : memref<36x8x16xf32, #tpu.memory_space<vmem>>, vector<1x8x16xf32>
    %492 = vector.shape_cast %491 : vector<1x8x16xf32> to vector<8x16xf32>
    %493 = arith.mulf %490, %492 : vector<8x16xf32>
    %494 = arith.addf %476, %493 : vector<8x16xf32>
    %c0_307 = arith.constant 0 : index
    %c27_308 = arith.constant 27 : index
    %495 = memref.load %arg2[%c0_307, %c27_308] : memref<3x36xf32, #tpu.memory_space<smem>>
    %496 = vector.broadcast %495 : f32 to vector<8x16xf32>
    %497 = arith.mulf %496, %493 : vector<8x16xf32>
    %498 = arith.addf %480, %497 : vector<8x16xf32>
    %c1_309 = arith.constant 1 : index
    %c27_310 = arith.constant 27 : index
    %499 = memref.load %arg2[%c1_309, %c27_310] : memref<3x36xf32, #tpu.memory_space<smem>>
    %500 = vector.broadcast %499 : f32 to vector<8x16xf32>
    %501 = arith.mulf %500, %493 : vector<8x16xf32>
    %502 = arith.addf %484, %501 : vector<8x16xf32>
    %c2_311 = arith.constant 2 : index
    %c27_312 = arith.constant 27 : index
    %503 = memref.load %arg2[%c2_311, %c27_312] : memref<3x36xf32, #tpu.memory_space<smem>>
    %504 = vector.broadcast %503 : f32 to vector<8x16xf32>
    %505 = arith.mulf %504, %493 : vector<8x16xf32>
    %506 = arith.addf %488, %505 : vector<8x16xf32>
    %c3_313 = arith.constant 3 : index
    %c0_314 = arith.constant 0 : index
    %c1_315 = arith.constant 1 : index
    %507 = vector.load %arg5[%c3_313, %c0_314, %c1_315] : memref<4x10x18xf32, #tpu.memory_space<vmem>>, vector<1x8x16xf32>
    %508 = vector.shape_cast %507 : vector<1x8x16xf32> to vector<8x16xf32>
    %c28 = arith.constant 28 : index
    %c0_316 = arith.constant 0 : index
    %c0_317 = arith.constant 0 : index
    %509 = vector.load %arg1[%c28, %c0_316, %c0_317] : memref<36x8x16xf32, #tpu.memory_space<vmem>>, vector<1x8x16xf32>
    %510 = vector.shape_cast %509 : vector<1x8x16xf32> to vector<8x16xf32>
    %511 = arith.mulf %508, %510 : vector<8x16xf32>
    %512 = arith.addf %494, %511 : vector<8x16xf32>
    %c0_318 = arith.constant 0 : index
    %c28_319 = arith.constant 28 : index
    %513 = memref.load %arg2[%c0_318, %c28_319] : memref<3x36xf32, #tpu.memory_space<smem>>
    %514 = vector.broadcast %513 : f32 to vector<8x16xf32>
    %515 = arith.mulf %514, %511 : vector<8x16xf32>
    %516 = arith.addf %498, %515 : vector<8x16xf32>
    %c1_320 = arith.constant 1 : index
    %c28_321 = arith.constant 28 : index
    %517 = memref.load %arg2[%c1_320, %c28_321] : memref<3x36xf32, #tpu.memory_space<smem>>
    %518 = vector.broadcast %517 : f32 to vector<8x16xf32>
    %519 = arith.mulf %518, %511 : vector<8x16xf32>
    %520 = arith.addf %502, %519 : vector<8x16xf32>
    %c2_322 = arith.constant 2 : index
    %c28_323 = arith.constant 28 : index
    %521 = memref.load %arg2[%c2_322, %c28_323] : memref<3x36xf32, #tpu.memory_space<smem>>
    %522 = vector.broadcast %521 : f32 to vector<8x16xf32>
    %523 = arith.mulf %522, %511 : vector<8x16xf32>
    %524 = arith.addf %506, %523 : vector<8x16xf32>
    %c3_324 = arith.constant 3 : index
    %c0_325 = arith.constant 0 : index
    %c2_326 = arith.constant 2 : index
    %525 = vector.load %arg5[%c3_324, %c0_325, %c2_326] : memref<4x10x18xf32, #tpu.memory_space<vmem>>, vector<1x8x16xf32>
    %526 = vector.shape_cast %525 : vector<1x8x16xf32> to vector<8x16xf32>
    %c29 = arith.constant 29 : index
    %c0_327 = arith.constant 0 : index
    %c0_328 = arith.constant 0 : index
    %527 = vector.load %arg1[%c29, %c0_327, %c0_328] : memref<36x8x16xf32, #tpu.memory_space<vmem>>, vector<1x8x16xf32>
    %528 = vector.shape_cast %527 : vector<1x8x16xf32> to vector<8x16xf32>
    %529 = arith.mulf %526, %528 : vector<8x16xf32>
    %530 = arith.addf %512, %529 : vector<8x16xf32>
    %c0_329 = arith.constant 0 : index
    %c29_330 = arith.constant 29 : index
    %531 = memref.load %arg2[%c0_329, %c29_330] : memref<3x36xf32, #tpu.memory_space<smem>>
    %532 = vector.broadcast %531 : f32 to vector<8x16xf32>
    %533 = arith.mulf %532, %529 : vector<8x16xf32>
    %534 = arith.addf %516, %533 : vector<8x16xf32>
    %c1_331 = arith.constant 1 : index
    %c29_332 = arith.constant 29 : index
    %535 = memref.load %arg2[%c1_331, %c29_332] : memref<3x36xf32, #tpu.memory_space<smem>>
    %536 = vector.broadcast %535 : f32 to vector<8x16xf32>
    %537 = arith.mulf %536, %529 : vector<8x16xf32>
    %538 = arith.addf %520, %537 : vector<8x16xf32>
    %c2_333 = arith.constant 2 : index
    %c29_334 = arith.constant 29 : index
    %539 = memref.load %arg2[%c2_333, %c29_334] : memref<3x36xf32, #tpu.memory_space<smem>>
    %540 = vector.broadcast %539 : f32 to vector<8x16xf32>
    %541 = arith.mulf %540, %529 : vector<8x16xf32>
    %542 = arith.addf %524, %541 : vector<8x16xf32>
    %c3_335 = arith.constant 3 : index
    %c1_336 = arith.constant 1 : index
    %c0_337 = arith.constant 0 : index
    %543 = vector.load %arg5[%c3_335, %c1_336, %c0_337] : memref<4x10x18xf32, #tpu.memory_space<vmem>>, vector<1x8x16xf32>
    %544 = vector.shape_cast %543 : vector<1x8x16xf32> to vector<8x16xf32>
    %c30 = arith.constant 30 : index
    %c0_338 = arith.constant 0 : index
    %c0_339 = arith.constant 0 : index
    %545 = vector.load %arg1[%c30, %c0_338, %c0_339] : memref<36x8x16xf32, #tpu.memory_space<vmem>>, vector<1x8x16xf32>
    %546 = vector.shape_cast %545 : vector<1x8x16xf32> to vector<8x16xf32>
    %547 = arith.mulf %544, %546 : vector<8x16xf32>
    %548 = arith.addf %530, %547 : vector<8x16xf32>
    %c0_340 = arith.constant 0 : index
    %c30_341 = arith.constant 30 : index
    %549 = memref.load %arg2[%c0_340, %c30_341] : memref<3x36xf32, #tpu.memory_space<smem>>
    %550 = vector.broadcast %549 : f32 to vector<8x16xf32>
    %551 = arith.mulf %550, %547 : vector<8x16xf32>
    %552 = arith.addf %534, %551 : vector<8x16xf32>
    %c1_342 = arith.constant 1 : index
    %c30_343 = arith.constant 30 : index
    %553 = memref.load %arg2[%c1_342, %c30_343] : memref<3x36xf32, #tpu.memory_space<smem>>
    %554 = vector.broadcast %553 : f32 to vector<8x16xf32>
    %555 = arith.mulf %554, %547 : vector<8x16xf32>
    %556 = arith.addf %538, %555 : vector<8x16xf32>
    %c2_344 = arith.constant 2 : index
    %c30_345 = arith.constant 30 : index
    %557 = memref.load %arg2[%c2_344, %c30_345] : memref<3x36xf32, #tpu.memory_space<smem>>
    %558 = vector.broadcast %557 : f32 to vector<8x16xf32>
    %559 = arith.mulf %558, %547 : vector<8x16xf32>
    %560 = arith.addf %542, %559 : vector<8x16xf32>
    %c3_346 = arith.constant 3 : index
    %c1_347 = arith.constant 1 : index
    %c1_348 = arith.constant 1 : index
    %561 = vector.load %arg5[%c3_346, %c1_347, %c1_348] : memref<4x10x18xf32, #tpu.memory_space<vmem>>, vector<1x8x16xf32>
    %562 = vector.shape_cast %561 : vector<1x8x16xf32> to vector<8x16xf32>
    %c31 = arith.constant 31 : index
    %c0_349 = arith.constant 0 : index
    %c0_350 = arith.constant 0 : index
    %563 = vector.load %arg1[%c31, %c0_349, %c0_350] : memref<36x8x16xf32, #tpu.memory_space<vmem>>, vector<1x8x16xf32>
    %564 = vector.shape_cast %563 : vector<1x8x16xf32> to vector<8x16xf32>
    %565 = arith.mulf %562, %564 : vector<8x16xf32>
    %566 = arith.addf %548, %565 : vector<8x16xf32>
    %c0_351 = arith.constant 0 : index
    %c31_352 = arith.constant 31 : index
    %567 = memref.load %arg2[%c0_351, %c31_352] : memref<3x36xf32, #tpu.memory_space<smem>>
    %568 = vector.broadcast %567 : f32 to vector<8x16xf32>
    %569 = arith.mulf %568, %565 : vector<8x16xf32>
    %570 = arith.addf %552, %569 : vector<8x16xf32>
    %c1_353 = arith.constant 1 : index
    %c31_354 = arith.constant 31 : index
    %571 = memref.load %arg2[%c1_353, %c31_354] : memref<3x36xf32, #tpu.memory_space<smem>>
    %572 = vector.broadcast %571 : f32 to vector<8x16xf32>
    %573 = arith.mulf %572, %565 : vector<8x16xf32>
    %574 = arith.addf %556, %573 : vector<8x16xf32>
    %c2_355 = arith.constant 2 : index
    %c31_356 = arith.constant 31 : index
    %575 = memref.load %arg2[%c2_355, %c31_356] : memref<3x36xf32, #tpu.memory_space<smem>>
    %576 = vector.broadcast %575 : f32 to vector<8x16xf32>
    %577 = arith.mulf %576, %565 : vector<8x16xf32>
    %578 = arith.addf %560, %577 : vector<8x16xf32>
    %c3_357 = arith.constant 3 : index
    %c1_358 = arith.constant 1 : index
    %c2_359 = arith.constant 2 : index
    %579 = vector.load %arg5[%c3_357, %c1_358, %c2_359] : memref<4x10x18xf32, #tpu.memory_space<vmem>>, vector<1x8x16xf32>
    %580 = vector.shape_cast %579 : vector<1x8x16xf32> to vector<8x16xf32>
    %c32 = arith.constant 32 : index
    %c0_360 = arith.constant 0 : index
    %c0_361 = arith.constant 0 : index
    %581 = vector.load %arg1[%c32, %c0_360, %c0_361] : memref<36x8x16xf32, #tpu.memory_space<vmem>>, vector<1x8x16xf32>
    %582 = vector.shape_cast %581 : vector<1x8x16xf32> to vector<8x16xf32>
    %583 = arith.mulf %580, %582 : vector<8x16xf32>
    %584 = arith.addf %566, %583 : vector<8x16xf32>
    %c0_362 = arith.constant 0 : index
    %c32_363 = arith.constant 32 : index
    %585 = memref.load %arg2[%c0_362, %c32_363] : memref<3x36xf32, #tpu.memory_space<smem>>
    %586 = vector.broadcast %585 : f32 to vector<8x16xf32>
    %587 = arith.mulf %586, %583 : vector<8x16xf32>
    %588 = arith.addf %570, %587 : vector<8x16xf32>
    %c1_364 = arith.constant 1 : index
    %c32_365 = arith.constant 32 : index
    %589 = memref.load %arg2[%c1_364, %c32_365] : memref<3x36xf32, #tpu.memory_space<smem>>
    %590 = vector.broadcast %589 : f32 to vector<8x16xf32>
    %591 = arith.mulf %590, %583 : vector<8x16xf32>
    %592 = arith.addf %574, %591 : vector<8x16xf32>
    %c2_366 = arith.constant 2 : index
    %c32_367 = arith.constant 32 : index
    %593 = memref.load %arg2[%c2_366, %c32_367] : memref<3x36xf32, #tpu.memory_space<smem>>
    %594 = vector.broadcast %593 : f32 to vector<8x16xf32>
    %595 = arith.mulf %594, %583 : vector<8x16xf32>
    %596 = arith.addf %578, %595 : vector<8x16xf32>
    %c3_368 = arith.constant 3 : index
    %c2_369 = arith.constant 2 : index
    %c0_370 = arith.constant 0 : index
    %597 = vector.load %arg5[%c3_368, %c2_369, %c0_370] : memref<4x10x18xf32, #tpu.memory_space<vmem>>, vector<1x8x16xf32>
    %598 = vector.shape_cast %597 : vector<1x8x16xf32> to vector<8x16xf32>
    %c33 = arith.constant 33 : index
    %c0_371 = arith.constant 0 : index
    %c0_372 = arith.constant 0 : index
    %599 = vector.load %arg1[%c33, %c0_371, %c0_372] : memref<36x8x16xf32, #tpu.memory_space<vmem>>, vector<1x8x16xf32>
    %600 = vector.shape_cast %599 : vector<1x8x16xf32> to vector<8x16xf32>
    %601 = arith.mulf %598, %600 : vector<8x16xf32>
    %602 = arith.addf %584, %601 : vector<8x16xf32>
    %c0_373 = arith.constant 0 : index
    %c33_374 = arith.constant 33 : index
    %603 = memref.load %arg2[%c0_373, %c33_374] : memref<3x36xf32, #tpu.memory_space<smem>>
    %604 = vector.broadcast %603 : f32 to vector<8x16xf32>
    %605 = arith.mulf %604, %601 : vector<8x16xf32>
    %606 = arith.addf %588, %605 : vector<8x16xf32>
    %c1_375 = arith.constant 1 : index
    %c33_376 = arith.constant 33 : index
    %607 = memref.load %arg2[%c1_375, %c33_376] : memref<3x36xf32, #tpu.memory_space<smem>>
    %608 = vector.broadcast %607 : f32 to vector<8x16xf32>
    %609 = arith.mulf %608, %601 : vector<8x16xf32>
    %610 = arith.addf %592, %609 : vector<8x16xf32>
    %c2_377 = arith.constant 2 : index
    %c33_378 = arith.constant 33 : index
    %611 = memref.load %arg2[%c2_377, %c33_378] : memref<3x36xf32, #tpu.memory_space<smem>>
    %612 = vector.broadcast %611 : f32 to vector<8x16xf32>
    %613 = arith.mulf %612, %601 : vector<8x16xf32>
    %614 = arith.addf %596, %613 : vector<8x16xf32>
    %c3_379 = arith.constant 3 : index
    %c2_380 = arith.constant 2 : index
    %c1_381 = arith.constant 1 : index
    %615 = vector.load %arg5[%c3_379, %c2_380, %c1_381] : memref<4x10x18xf32, #tpu.memory_space<vmem>>, vector<1x8x16xf32>
    %616 = vector.shape_cast %615 : vector<1x8x16xf32> to vector<8x16xf32>
    %c34 = arith.constant 34 : index
    %c0_382 = arith.constant 0 : index
    %c0_383 = arith.constant 0 : index
    %617 = vector.load %arg1[%c34, %c0_382, %c0_383] : memref<36x8x16xf32, #tpu.memory_space<vmem>>, vector<1x8x16xf32>
    %618 = vector.shape_cast %617 : vector<1x8x16xf32> to vector<8x16xf32>
    %619 = arith.mulf %616, %618 : vector<8x16xf32>
    %620 = arith.addf %602, %619 : vector<8x16xf32>
    %c0_384 = arith.constant 0 : index
    %c34_385 = arith.constant 34 : index
    %621 = memref.load %arg2[%c0_384, %c34_385] : memref<3x36xf32, #tpu.memory_space<smem>>
    %622 = vector.broadcast %621 : f32 to vector<8x16xf32>
    %623 = arith.mulf %622, %619 : vector<8x16xf32>
    %624 = arith.addf %606, %623 : vector<8x16xf32>
    %c1_386 = arith.constant 1 : index
    %c34_387 = arith.constant 34 : index
    %625 = memref.load %arg2[%c1_386, %c34_387] : memref<3x36xf32, #tpu.memory_space<smem>>
    %626 = vector.broadcast %625 : f32 to vector<8x16xf32>
    %627 = arith.mulf %626, %619 : vector<8x16xf32>
    %628 = arith.addf %610, %627 : vector<8x16xf32>
    %c2_388 = arith.constant 2 : index
    %c34_389 = arith.constant 34 : index
    %629 = memref.load %arg2[%c2_388, %c34_389] : memref<3x36xf32, #tpu.memory_space<smem>>
    %630 = vector.broadcast %629 : f32 to vector<8x16xf32>
    %631 = arith.mulf %630, %619 : vector<8x16xf32>
    %632 = arith.addf %614, %631 : vector<8x16xf32>
    %c3_390 = arith.constant 3 : index
    %c2_391 = arith.constant 2 : index
    %c2_392 = arith.constant 2 : index
    %633 = vector.load %arg5[%c3_390, %c2_391, %c2_392] : memref<4x10x18xf32, #tpu.memory_space<vmem>>, vector<1x8x16xf32>
    %634 = vector.shape_cast %633 : vector<1x8x16xf32> to vector<8x16xf32>
    %c35 = arith.constant 35 : index
    %c0_393 = arith.constant 0 : index
    %c0_394 = arith.constant 0 : index
    %635 = vector.load %arg1[%c35, %c0_393, %c0_394] : memref<36x8x16xf32, #tpu.memory_space<vmem>>, vector<1x8x16xf32>
    %636 = vector.shape_cast %635 : vector<1x8x16xf32> to vector<8x16xf32>
    %637 = arith.mulf %634, %636 : vector<8x16xf32>
    %638 = arith.addf %620, %637 : vector<8x16xf32>
    %c0_395 = arith.constant 0 : index
    %c35_396 = arith.constant 35 : index
    %639 = memref.load %arg2[%c0_395, %c35_396] : memref<3x36xf32, #tpu.memory_space<smem>>
    %640 = vector.broadcast %639 : f32 to vector<8x16xf32>
    %641 = arith.mulf %640, %637 : vector<8x16xf32>
    %642 = arith.addf %624, %641 : vector<8x16xf32>
    %c1_397 = arith.constant 1 : index
    %c35_398 = arith.constant 35 : index
    %643 = memref.load %arg2[%c1_397, %c35_398] : memref<3x36xf32, #tpu.memory_space<smem>>
    %644 = vector.broadcast %643 : f32 to vector<8x16xf32>
    %645 = arith.mulf %644, %637 : vector<8x16xf32>
    %646 = arith.addf %628, %645 : vector<8x16xf32>
    %c2_399 = arith.constant 2 : index
    %c35_400 = arith.constant 35 : index
    %647 = memref.load %arg2[%c2_399, %c35_400] : memref<3x36xf32, #tpu.memory_space<smem>>
    %648 = vector.broadcast %647 : f32 to vector<8x16xf32>
    %649 = arith.mulf %648, %637 : vector<8x16xf32>
    %650 = arith.addf %632, %649 : vector<8x16xf32>
    %cst = arith.constant 0.000000e+00 : f32
    %651 = vector.broadcast %cst : f32 to vector<8x16xf32>
    %652 = arith.cmpf oge, %638, %651 : vector<8x16xf32>
    %cst_401 = arith.constant 2.000000e-01 : f32
    %653 = vector.broadcast %cst_401 : f32 to vector<8x16xf32>
    %654 = arith.mulf %653, %638 : vector<8x16xf32>
    %655 = arith.select %652, %638, %654 : vector<8x16xi1>, vector<8x16xf32>
    %c0_402 = arith.constant 0 : index
    %c0_403 = arith.constant 0 : index
    %c0_404 = arith.constant 0 : index
    %656 = vector.load %arg4[%c0_402, %c0_403, %c0_404] : memref<4x8x16xf32, #tpu.memory_space<vmem>>, vector<1x8x16xf32>
    %657 = vector.shape_cast %656 : vector<1x8x16xf32> to vector<8x16xf32>
    %658 = vector.shape_cast %655 : vector<8x16xf32> to vector<1x8x16xf32>
    tpu.vector_store %arg4[%c0_402, %c0_403, %c0_404], %658 {strides = array<i32>} : memref<4x8x16xf32, #tpu.memory_space<vmem>>, vector<1x8x16xf32>,
    %cst_405 = arith.constant 0.000000e+00 : f32
    %659 = vector.broadcast %cst_405 : f32 to vector<8x16xf32>
    %660 = arith.cmpf oge, %642, %659 : vector<8x16xf32>
    %cst_406 = arith.constant 2.000000e-01 : f32
    %661 = vector.broadcast %cst_406 : f32 to vector<8x16xf32>
    %662 = arith.mulf %661, %642 : vector<8x16xf32>
    %663 = arith.select %660, %642, %662 : vector<8x16xi1>, vector<8x16xf32>
    %c1_407 = arith.constant 1 : index
    %c0_408 = arith.constant 0 : index
    %c0_409 = arith.constant 0 : index
    %664 = vector.load %arg4[%c1_407, %c0_408, %c0_409] : memref<4x8x16xf32, #tpu.memory_space<vmem>>, vector<1x8x16xf32>
    %665 = vector.shape_cast %664 : vector<1x8x16xf32> to vector<8x16xf32>
    %666 = vector.shape_cast %663 : vector<8x16xf32> to vector<1x8x16xf32>
    tpu.vector_store %arg4[%c1_407, %c0_408, %c0_409], %666 {strides = array<i32>} : memref<4x8x16xf32, #tpu.memory_space<vmem>>, vector<1x8x16xf32>,
    %cst_410 = arith.constant 0.000000e+00 : f32
    %667 = vector.broadcast %cst_410 : f32 to vector<8x16xf32>
    %668 = arith.cmpf oge, %646, %667 : vector<8x16xf32>
    %cst_411 = arith.constant 2.000000e-01 : f32
    %669 = vector.broadcast %cst_411 : f32 to vector<8x16xf32>
    %670 = arith.mulf %669, %646 : vector<8x16xf32>
    %671 = arith.select %668, %646, %670 : vector<8x16xi1>, vector<8x16xf32>
    %c2_412 = arith.constant 2 : index
    %c0_413 = arith.constant 0 : index
    %c0_414 = arith.constant 0 : index
    %672 = vector.load %arg4[%c2_412, %c0_413, %c0_414] : memref<4x8x16xf32, #tpu.memory_space<vmem>>, vector<1x8x16xf32>
    %673 = vector.shape_cast %672 : vector<1x8x16xf32> to vector<8x16xf32>
    %674 = vector.shape_cast %671 : vector<8x16xf32> to vector<1x8x16xf32>
    tpu.vector_store %arg4[%c2_412, %c0_413, %c0_414], %674 {strides = array<i32>} : memref<4x8x16xf32, #tpu.memory_space<vmem>>, vector<1x8x16xf32>,
    %cst_415 = arith.constant 0.000000e+00 : f32
    %675 = vector.broadcast %cst_415 : f32 to vector<8x16xf32>
    %676 = arith.cmpf oge, %650, %675 : vector<8x16xf32>
    %cst_416 = arith.constant 2.000000e-01 : f32
    %677 = vector.broadcast %cst_416 : f32 to vector<8x16xf32>
    %678 = arith.mulf %677, %650 : vector<8x16xf32>
    %679 = arith.select %676, %650, %678 : vector<8x16xi1>, vector<8x16xf32>
    %c3_417 = arith.constant 3 : index
    %c0_418 = arith.constant 0 : index
    %c0_419 = arith.constant 0 : index
    %680 = vector.load %arg4[%c3_417, %c0_418, %c0_419] : memref<4x8x16xf32, #tpu.memory_space<vmem>>, vector<1x8x16xf32>
    %681 = vector.shape_cast %680 : vector<1x8x16xf32> to vector<8x16xf32>
    %682 = vector.shape_cast %679 : vector<8x16xf32> to vector<1x8x16xf32>
    tpu.vector_store %arg4[%c3_417, %c0_418, %c0_419], %682 {strides = array<i32>} : memref<4x8x16xf32, #tpu.memory_space<vmem>>, vector<1x8x16xf32>,
    return
  }
  func.func @transform_0(%arg0: i32) -> (i32, i32, i32) {
    %c0_i32 = arith.constant 0 : i32
    %c0_i32_0 = arith.constant 0 : i32
    %c0_i32_1 = arith.constant 0 : i32
    return %c0_i32, %arg0, %c0_i32_0 : i32, i32, i32
  }
  func.func @transform_1(%arg0: i32) -> (i32, i32) {
    %c0_i32 = arith.constant 0 : i32
    %c0_i32_0 = arith.constant 0 : i32
    %c0_i32_1 = arith.constant 0 : i32
    return %c0_i32, %c0_i32_0 : i32, i32
  }
  func.func @transform_3(%arg0: i32) -> (i32, i32, i32) {
    %c0_i32 = arith.constant 0 : i32
    %c0_i32_0 = arith.constant 0 : i32
    %c0_i32_1 = arith.constant 0 : i32
    return %c0_i32, %arg0, %c0_i32_0 : i32, i32, i32
  }
}

</mosaic_0001>

<bundles_post_ra>
// kernel: spatially_adaptive_forward.1
= control target key start
LH: loop header
LB: loop body
LE: loop exit
PB: predicated region body
PF: predicated region fallthrough
CT: control target
= control target key end

     0   :  { %8 = vsyncpa [#allocation7], 0  ;;  %s2631_s0 = inlined_call_operand.vmem [shape: f32[36,16,16], index: 0, kind: input, shape index: {}]   ;;  %s2632_s1 = inlined_call_operand.vmem [shape: f32[3,36], index: 1, kind: input, shape index: {}]   ;;  %s2633_s2 = inlined_call_operand.vmem [shape: f32[4,18,18], index: 2, kind: input, shape index: {}]   ;;  %s2634_s3 = inlined_call_operand.hbm [shape: f32[4,16,16], index: 3, kind: output, shape index: {}]  }
   0x1   :  { %9 = vsyncpa [#allocation6], 0 }
   0x2   :  { %11 = vsyncpa [#allocation6 + $0x1], 0  ;;  %s1947_s12 = smov 0   ;;  %s1949_s13 = smov 0  }
   0x3   :  { %s1951_s14 = smov 0   ;;  %s1953_s15 = smov 0  }
   0x4 LB: > { %s1968_s16 = sadd.s32 4294967295, %s1916_s15   ;;  %s1613_s17 = sadd.s32 4294967294, %s1916_s15   ;;  %s1916_s15 = sphi %s1953_s15, %s2645_s15   ;;  %s1912_s14 = sphi %s1951_s14, %s2644_s14   ;;  %s1908_s13 = sphi %s1949_s13, %s2643_s13   ;;  %s1904_s12 = sphi %s1947_s12, %s2642_s12  }
   0x5   : > { %s1972_s18 = sadd.s32 1, %s1916_s15   ;;  %s24_s19 = sadd.s32 1, %s1912_s14 }
   0x6   : > { %s21_s20 = ssub.s32 %s1916_s15, %s1972_s18  ;;  %p31_p0 = scmp.ne.s32.totalorder %s1912_s14, %s1908_s13 }
   0x7   : > { %p22_p1 = scmp.eq.s32.totalorder %s21_s20, 0  ;;  %p32_p2 = scmp.eq.s32.totalorder %s1916_s15, 0 }
   0x8   : > { %p82_p3 = scmp.eq.s32.totalorder %s1968_s16, 1  ;;  %p87_p4 = scmp.ne.s32.totalorder %s1908_s13, %s1904_s12 }
   0x9   : > { %s1984_s21 = scalar_select %p22_p1, %s1912_s14, %s24_s19  }
   0xa   : > { %p1986_p5 = por %p32_p2, %p31_p0  ;;  %p1990_p6 = por %p82_p3, %p31_p0 }
   0xb   : > { %p88_p7 = scmp.eq.s32.totalorder %s1613_s17, 1  ;;  %p1614_p8 = scmp.ge.s32.totalorder %s1916_s15, 1 }
   0xc   : > { %s2637_s23 = scalar_select %p1990_p6, 1, 0 }
   0xd   : > { %p95_p9 = scmp.lt.s32.totalorder %s1916_s15, 3  ;;  %p1996_p10 = por %p88_p7, %p87_p4 }
   0xe   : > { %p1792_p11 = scmp.eq.s32.totalorder %s1968_s16, 0  ;;  %s108_s28 = sshll.u32 %s2632_s1, 4  ;;  %s109_s28 = int_to_ptr.vmem [resolvable:$true] %s108_s28 }
   0xf   : > { %s2638_s24 = scalar_select %p1996_p10, 1, 0 }
  0x10   : > { %p2001_p12 = pnand %p1614_p8, %p95_p9  ;;  %s1835_s29 = scalar_lea.vmem %s109_s28, 64 }
  0x11   : > { %p1836_p1 = scmp.ne.s32.totalorder %s109_s28, %s1835_s29  ;;  %p1843_p7 = scmp.lt.s32.totalorder %s109_s28, %s109_s28 }
  0x12   : > { %p1784_p13 = pneg %p2001_p12  ;;  %p1844_p8 = scmp.lt.s32.totalorder %s1835_s29, %s1835_s29 }
  0x14   : > { %p1785_p0 = pnand %p1792_p11, %p1784_p13  ;;  %p1845_p9 = por %p1844_p8, %p1843_p7 }
  0x16   : > { %p1837_p2 = pneg %p1785_p0 }
  0x18   : > { %p1838_p3 = pnand %p1837_p2, %p1836_p1 }
  0x1a   : > { %p1839_p4 = pneg %p1838_p3 }
  0x1c   : > { %p1846_p10 = pnand %p1845_p9, %p1839_p4 }
  0x1e   : > { %1849 = shalt.err (!%p1846_p10)
}
  0x1f   : > { %s1918_s30 = smov [#allocation5]   ;;  %p1616_p6 = scmp.ge.s32.totalorder %s1916_s15, 2 }
  0x20   : > { %1787 = dma.vmem_to_smem (!%p1785_p0), %s109_s28, 64, %s1918_s30, [#allocation7]  }
  0x21   : > { %115 = sbr.rel (%p1616_p6) target bundleno = 60 (0x3c), region = 20 }
  0x26   : > { %118 = sbr.rel (!%p1986_p5) target bundleno = 60 (0x3c), region = 24  ;;  %s120_s4 = sand.u32 (%p1986_p5), 1, %s1912_s14  }
  0x27   : > { %s1617_s5 = sshll.u32 (%p1986_p5), %s1916_s15, 3  ;;  %s1776_s6 = smul.u32 (%p1986_p5), 288, %s120_s4 }
  0x28   : > { %s2022_s9 = scalar_lea.vmem (%p1986_p5), %s2631_s0, %s1617_s5 }
  0x29   : > { %v223_v0 = vld [vmem:[%s2022_s9] sm:$0xff] (%p1986_p5)  ;;  %v225_v1 = vld [vmem:[%s2022_s9 + $0x10] sm:$0xff] (%p1986_p5)  ;;  %s2030_s10 = scalar_lea.vmem (%p1986_p5), [#allocation4], %s1776_s6 }
  0x2a   : > { %v227_v2 = vld [vmem:[%s2022_s9 + $0x20] sm:$0xff] (%p1986_p5)  ;;  %v229_v3 = vld [vmem:[%s2022_s9 + $0x30] sm:$0xff] (%p1986_p5)  ;;  %224 = vst [vmem:[%s2030_s10] sm:$0xff] (%p1986_p5), %v223_v0  ;;  %226 = vst [vmem:[%s2030_s10 + $0x8] sm:$0xff] (%p1986_p5), %v225_v1 }
  0x2b   : > { %v231_v4 = vld [vmem:[%s2022_s9 + $0x40] sm:$0xff]  ;;  %v233_v5 = vld [vmem:[%s2022_s9 + $0x50] sm:$0xff]  ;;  %228 = vst [vmem:[%s2030_s10 + $0x10] sm:$0xff] %v227_v2  ;;  %230 = vst [vmem:[%s2030_s10 + $0x18] sm:$0xff] %v229_v3 }
  0x2c   : > { %232 = vst [vmem:[%s2030_s10 + $0x20] sm:$0xff] %v231_v4  ;;  %234 = vst [vmem:[%s2030_s10 + $0x28] sm:$0xff] %v233_v5  ;;  %v235_v6 = vld [vmem:[%s2022_s9 + $0x60] sm:$0xff]  ;;  %v237_v7 = vld [vmem:[%s2022_s9 + $0x70] sm:$0xff] }
  0x2d   : > { %v239_v8 = vld [vmem:[%s2022_s9 + $0x80] sm:$0xff]  ;;  %236 = vst [vmem:[%s2030_s10 + $0x30] sm:$0xff] %v235_v6  ;;  %238 = vst [vmem:[%s2030_s10 + $0x38] sm:$0xff] %v237_v7  ;;  %v241_v9 = vld [vmem:[%s2022_s9 + $0x90] sm:$0xff] }
  0x2e   : > { %240 = vst [vmem:[%s2030_s10 + $0x40] sm:$0xff] %v239_v8  ;;  %v243_v10 = vld [vmem:[%s2022_s9 + $0xa0] sm:$0xff]  ;;  %v245_v11 = vld [vmem:[%s2022_s9 + $0xb0] sm:$0xff]  ;;  %242 = vst [vmem:[%s2030_s10 + $0x48] sm:$0xff] %v241_v9 }
  0x2f   : > { %244 = vst [vmem:[%s2030_s10 + $0x50] sm:$0xff] %v243_v10  ;;  %246 = vst [vmem:[%s2030_s10 + $0x58] sm:$0xff] %v245_v11  ;;  %v247_v12 = vld [vmem:[%s2022_s9 + $0xc0] sm:$0xff]  ;;  %v249_v13 = vld [vmem:[%s2022_s9 + $0xd0] sm:$0xff] }
  0x30   : > { %v251_v14 = vld [vmem:[%s2022_s9 + $0xe0] sm:$0xff]  ;;  %248 = vst [vmem:[%s2030_s10 + $0x60] sm:$0xff] %v247_v12  ;;  %250 = vst [vmem:[%s2030_s10 + $0x68] sm:$0xff] %v249_v13  ;;  %v253_v15 = vld [vmem:[%s2022_s9 + $0xf0] sm:$0xff] }
  0x31   : > { %252 = vst [vmem:[%s2030_s10 + $0x70] sm:$0xff] %v251_v14  ;;  %v255_v16 = vld [vmem:[%s2022_s9 + $0x100] sm:$0xff]  ;;  %v257_v17 = vld [vmem:[%s2022_s9 + $0x110] sm:$0xff]  ;;  %254 = vst [vmem:[%s2030_s10 + $0x78] sm:$0xff] %v253_v15 }
  0x32   : > { %256 = vst [vmem:[%s2030_s10 + $0x80] sm:$0xff] %v255_v16  ;;  %258 = vst [vmem:[%s2030_s10 + $0x88] sm:$0xff] %v257_v17  ;;  %v259_v18 = vld [vmem:[%s2022_s9 + $0x120] sm:$0xff]  ;;  %v261_v19 = vld [vmem:[%s2022_s9 + $0x130] sm:$0xff] }
  0x33   : > { %v263_v20 = vld [vmem:[%s2022_s9 + $0x140] sm:$0xff]  ;;  %260 = vst [vmem:[%s2030_s10 + $0x90] sm:$0xff] %v259_v18  ;;  %262 = vst [vmem:[%s2030_s10 + $0x98] sm:$0xff] %v261_v19  ;;  %v265_v21 = vld [vmem:[%s2022_s9 + $0x150] sm:$0xff] }
  0x34   : > { %264 = vst [vmem:[%s2030_s10 + $0xa0] sm:$0xff] %v263_v20  ;;  %v267_v22 = vld [vmem:[%s2022_s9 + $0x160] sm:$0xff]  ;;  %v269_v23 = vld [vmem:[%s2022_s9 + $0x170] sm:$0xff]  ;;  %266 = vst [vmem:[%s2030_s10 + $0xa8] sm:$0xff] %v265_v21 }
  0x35   : > { %268 = vst [vmem:[%s2030_s10 + $0xb0] sm:$0xff] %v267_v22  ;;  %270 = vst [vmem:[%s2030_s10 + $0xb8] sm:$0xff] %v269_v23  ;;  %v271_v24 = vld [vmem:[%s2022_s9 + $0x180] sm:$0xff]  ;;  %v273_v25 = vld [vmem:[%s2022_s9 + $0x190] sm:$0xff] }
  0x36   : > { %v275_v26 = vld [vmem:[%s2022_s9 + $0x1a0] sm:$0xff]  ;;  %272 = vst [vmem:[%s2030_s10 + $0xc0] sm:$0xff] %v271_v24  ;;  %274 = vst [vmem:[%s2030_s10 + $0xc8] sm:$0xff] %v273_v25  ;;  %v277_v27 = vld [vmem:[%s2022_s9 + $0x1b0] sm:$0xff] }
  0x37   : > { %276 = vst [vmem:[%s2030_s10 + $0xd0] sm:$0xff] %v275_v26  ;;  %v279_v28 = vld [vmem:[%s2022_s9 + $0x1c0] sm:$0xff]  ;;  %v281_v29 = vld [vmem:[%s2022_s9 + $0x1d0] sm:$0xff]  ;;  %278 = vst [vmem:[%s2030_s10 + $0xd8] sm:$0xff] %v277_v27 }
  0x38   : > { %280 = vst [vmem:[%s2030_s10 + $0xe0] sm:$0xff] %v279_v28  ;;  %282 = vst [vmem:[%s2030_s10 + $0xe8] sm:$0xff] %v281_v29  ;;  %v283_v30 = vld [vmem:[%s2022_s9 + $0x1e0] sm:$0xff]  ;;  %v285_v31 = vld [vmem:[%s2022_s9 + $0x1f0] sm:$0xff] }
  0x39   : > { %v287_v32 = vld [vmem:[%s2022_s9 + $0x200] sm:$0xff]  ;;  %284 = vst [vmem:[%s2030_s10 + $0xf0] sm:$0xff] %v283_v30  ;;  %286 = vst [vmem:[%s2030_s10 + $0xf8] sm:$0xff] %v285_v31  ;;  %v289_v33 = vld [vmem:[%s2022_s9 + $0x210] sm:$0xff] }
  0x3a   : > { %288 = vst [vmem:[%s2030_s10 + $0x100] sm:$0xff] %v287_v32  ;;  %v291_v34 = vld [vmem:[%s2022_s9 + $0x220] sm:$0xff]  ;;  %v293_v35 = vld [vmem:[%s2022_s9 + $0x230] sm:$0xff]  ;;  %290 = vst [vmem:[%s2030_s10 + $0x108] sm:$0xff] %v289_v33 }
  0x3b   : > { %292 = vst [vmem:[%s2030_s10 + $0x110] sm:$0xff] %v291_v34  ;;  %294 = vst [vmem:[%s2030_s10 + $0x118] sm:$0xff] %v293_v35 }
  0x3c PF: > { %303 = sbr.rel (%p2001_p12) target bundleno = 522 (0x20a), region = 62  ;;  %s2101_s11 = sand.u32 (!%p2001_p12), 1, %s1908_s13  }
  0x3d   : > { %s1777_s17 = smul.u32 (!%p2001_p12), 288, %s2101_s11 }
  0x3f   : > { %s2104_s19 = scalar_lea.vmem (!%p2001_p12), [#allocation4], %s1777_s17 }
  0x41   : > { %1893 = dma.done.wait (%p1792_p11), [#allocation7], 64  }
  0x42   : > { %1895 = vsyncadd (%p1792_p11), [#allocation7], 4294967232 }
  0x43   : > { %316 = sfence }
  0x44   : > { %s1620_s20 = sshll.u32 %s2101_s11, 5  ;;  %s1621_s22 = sshll.u32 %s1968_s16, 3 }
  0x45   : > { %s333_s27 = scalar_lea.vmem %s2633_s2, %s1621_s22  ;;  %s2115_s28 = scalar_lea.vmem [#allocation8], %s1620_s20 }
  0x46   : > { %v378_v36 = vld [vmem:[%s333_s27] sm:$0xff]  ;;  %v380_v37 = vld [vmem:[%s333_s27 + $0x18] sm:$0xff]  ;;  %v382_v38 = vld [vmem:[%s333_s27 + $0x30] sm:$0xff] }
  0x47   : > { %379 = vst [vmem:[#allocation2] sm:$0xff] %v378_v36  ;;  %381 = vst [vmem:[#allocation2 + $0x10] sm:$0xff] %v380_v37  ;;  %v384_v39 = vld [vmem:[%s333_s27 + $0x48] sm:$0xff]  ;;  %v1623_v41 = vld [vmem:[%s333_s27 + $0x20] sm:$0x3] }
  0x48   : > { %383 = vst [vmem:[#allocation2 + $0x20] sm:$0xff] %v382_v38  ;;  %v1622_v40 = vld [vmem:[%s333_s27 + $0x8] sm:$0x3]  ;;  %385 = vst [vmem:[#allocation2 + $0x30] sm:$0xff] %v384_v39  ;;  %v1624_v42 = vld [vmem:[%s333_s27 + $0x38] sm:$0x3] }
  0x49   : > { %397 = vst [vmem:[#allocation2 + $0x8] sm:$0x3] %v1622_v40  ;;  %399 = vst [vmem:[#allocation2 + $0x18] sm:$0x3] %v1623_v41  ;;  %v1625_v43 = vld [vmem:[%s333_s27 + $0x50] sm:$0x3] }
  0x4a   : > { %401 = vst [vmem:[#allocation2 + $0x28] sm:$0x3] %v1624_v42  ;;  %403 = vst [vmem:[#allocation2 + $0x38] sm:$0x3] %v1625_v43 }
  0x4b   : > { %407 = vsyncadd [#allocation3], 640 }
  0x4c   : > { %1896 = dma.done.wait [#allocation3], 640 }
  0x4d   : > { %1897 = vsyncadd [#allocation3], 4294966656  ;;  %v1628_v44 = vld [vmem:[%s2104_s19 + $0x8] sm:$0xff]  ;;  %v1632_v45 = vld [vmem:[%s2104_s19 + $0x10] sm:$0xff]  ;;  %s1919_s29 = smov 1   ;;  %s1920_s30 = smov 2  }
  0x4e   : > { %427 = vrot.lane.b32.xlu0 %v1628_v44, %s1919_s29  ;;  %463 = vrot.lane.b32.xlu1 %v1632_v45, %s1920_s30  ;;  %v1640_v46 = vld [vmem:[%s2104_s19 + $0x20] sm:$0xff]  ;;  %v1644_v47 = vld [vmem:[%s2104_s19 + $0x28] sm:$0xff]  ;;  %s1921_s4 = smov 127   ;;  %s1629_s5 = sld [smem:[#allocation5 + $0x1]]  ;;  %v2186_v18 = vld [vmem:[#allocation2 + $0x10] sm:$0xff]  ;;  %vm1481_vm0 = vcmask 130048  }
  0x4f   : > { %v1652_v48 = vld [vmem:[%s2104_s19 + $0x38] sm:$0xff]  ;;  %v1656_v49 = vld [vmem:[%s2104_s19 + $0x40] sm:$0xff]  ;;  %v1664_v50 = vld [vmem:[%s2104_s19 + $0x50] sm:$0xff]  ;;  %s1922_s6 = smov 126   ;;  %s1630_s7 = sld [smem:[#allocation5 + $0x81]] }
  0x50   : > { %v1668_v51 = vld [vmem:[%s2104_s19 + $0x58] sm:$0xff]  ;;  %v1676_v52 = vld [vmem:[%s2104_s19 + $0x68] sm:$0xff]  ;;  %v1680_v53 = vld [vmem:[%s2104_s19 + $0x70] sm:$0xff]  ;;  %s1633_s8 = sld [smem:[#allocation5 + $0x2]]  ;;  %p2640_p10 = scmp.ne.s32.totalorder %s2637_s23, 0 }
  0x51   : > { %v1688_v54 = vld [vmem:[%s2104_s19 + $0x80] sm:$0xff]  ;;  %v1692_v55 = vld [vmem:[%s2104_s19 + $0x88] sm:$0xff]  ;;  %v1700_v57 = vld [vmem:[%s2104_s19 + $0x98] sm:$0xff]  ;;  %s1631_s9 = sld [smem:[#allocation5 + $0x101]] }
  0x52   : > { %516 = vrot.lane.b32.xlu0 %v1640_v46, %s1919_s29  ;;  %552 = vrot.lane.b32.xlu1 %v1644_v47, %s1920_s30  ;;  %v1704_v56 = vld [vmem:[%s2104_s19 + $0xa0] sm:$0xff]  ;;  %v1712_v58 = vld [vmem:[%s2104_s19 + $0xb0] sm:$0xff]  ;;  %s1635_s10 = sld [smem:[#allocation5 + $0x102]] }
  0x53   : > { %v1716_v59 = vld [vmem:[%s2104_s19 + $0xb8] sm:$0xff]  ;;  %v1728_v60 = vld [vmem:[%s2104_s19 + $0xd0] sm:$0xff]  ;;  %v1724_v61 = vld [vmem:[%s2104_s19 + $0xc8] sm:$0xff]  ;;  %s1634_s17 = sld [smem:[#allocation5 + $0x82]] }
  0x54   : > { %v1736_v62 = vld [vmem:[%s2104_s19 + $0xe0] sm:$0xff]  ;;  %v1740_v63 = vld [vmem:[%s2104_s19 + $0xe8] sm:$0xff]  ;;  %v1748_v1 = vld [vmem:[%s2104_s19 + $0xf8] sm:$0xff]  ;;  %v437_v23 = vstv %s1629_s5  ;;  %s1642_s20 = sld [smem:[#allocation5 + $0x84]] }
  0x55   : > { %v1752_v0 = vld [vmem:[%s2104_s19 + $0x100] sm:$0xff]  ;;  %v1760_v2 = vld [vmem:[%s2104_s19 + $0x110] sm:$0xff]  ;;  %v1764_v3 = vld [vmem:[%s2104_s19 + $0x118] sm:$0xff]  ;;  %v445_v28 = vstv %s1630_s7  ;;  %s1641_s22 = sld [smem:[#allocation5 + $0x4]] }
  0x56   : > { %605 = vrot.lane.b32.xlu0 %v1652_v48, %s1919_s29  ;;  %641 = vrot.lane.b32.xlu1 %v1656_v49, %s1920_s30  ;;  %v2165_v4 = vld [vmem:[#allocation2] sm:$0xff]  ;;  %v2205_v25 = vld [vmem:[#allocation2 + $0x11] sm:$0xff]  ;;  %v473_v32 = vstv %s1633_s8  ;;  %s1645_s25 = sld [smem:[#allocation5 + $0x5]] }
  0x57   : > { %v2168_v8 = vld [vmem:[#allocation2 + $0x1] sm:$0xff]  ;;  %v453_v35 = vstv %s1631_s9  ;;  %s1643_s26 = sld [smem:[#allocation5 + $0x104]] }
  0x58   : > { %v2175_v13 = vld [vmem:[#allocation2 + $0x2] sm:$0xff]  ;;  %v489_v36 = vstv %s1635_s10  ;;  %s1647_s27 = sld [smem:[#allocation5 + $0x105]] }
  0x59   : > { %v481_v39 = vstv %s1634_s17  ;;  %s1653_s5 = sld [smem:[#allocation5 + $0x7]] }
  0x5a   : > { %695 = vrot.lane.b32.xlu0 %v1664_v50, %s1919_s29  ;;  %731 = vrot.lane.b32.xlu1 %v1668_v51, %s1920_s30  ;;  %v534_v40 = vstv %s1642_s20  ;;  %s1657_s7 = sld [smem:[#allocation5 + $0x8]] }
  0x5b   : > { %v526_v43 = vstv %s1641_s22  ;;  %s1655_s8 = sld [smem:[#allocation5 + $0x107]] }
  0x5c   : > { %v562_v44 = vstv %s1645_s25  ;;  %s1659_s9 = sld [smem:[#allocation5 + $0x108]] }
  0x5d   : > { %v542_v47 = vstv %s1643_s26  ;;  %s1658_s10 = sld [smem:[#allocation5 + $0x88]] }
  0x5e   : > { %784 = vrot.lane.b32.xlu1 %v1676_v52, %s1919_s29  ;;  %820 = vrot.lane.b32.xlu0 %v1680_v53, %s1920_s30  ;;  %v578_v48 = vstv %s1647_s27  ;;  %s1667_s17 = sld [smem:[#allocation5 + $0x10a]] }
  0x5f   : > { %s1665_s20 = sld [smem:[#allocation5 + $0xa]] }
  0x60   : > { %s1669_s22 = sld [smem:[#allocation5 + $0xb]] }
  0x61   : > { %s1666_s25 = sld [smem:[#allocation5 + $0x8a]] }
  0x62   : > { %873 = vrot.lane.b32.xlu0 %v1688_v54, %s1919_s29  ;;  %909 = vrot.lane.b32.xlu1 %v1692_v55, %s1920_s30  ;;  %v615_v55 = vstv %s1653_s5  ;;  %s1671_s26 = sld [smem:[#allocation5 + $0x10b]] }
  0x63   : > { %s1670_s27 = sld [smem:[#allocation5 + $0x8b]] }
  0x64   : > { %s1679_s5 = sld [smem:[#allocation5 + $0x10d]] }
  0x66   : > { %999 = vrot.lane.b32.xlu0 %v1704_v56, %s1920_s30  ;;  %963 = vrot.lane.b32.xlu1 %v1700_v57, %s1919_s29  ;;  %v651_v56 = vstv %s1657_s7  ;;  %s1682_s7 = sld [smem:[#allocation5 + $0x8e]] }
  0x6a   : > { %1052 = vrot.lane.b32.xlu0 %v1712_v58, %s1919_s29  ;;  %1088 = vrot.lane.b32.xlu1 %v1716_v59, %s1920_s30  ;;  %v631_v59 = vstv %s1655_s8  ;;  %s1681_s8 = sld [smem:[#allocation5 + $0xe]] }
  0x6e   : > { %1177 = vrot.lane.b32.xlu0 %v1728_v60, %s1920_s30  ;;  %1141 = vrot.lane.b32.xlu1 %v1724_v61, %s1919_s29  ;;  %v667_v60 = vstv %s1659_s9  ;;  %s1683_s9 = sld [smem:[#allocation5 + $0x10e]] }
  0x72   : > { %1231 = vrot.lane.b32.xlu0 %v1736_v62, %s1919_s29  ;;  %1267 = vrot.lane.b32.xlu1 %v1740_v63, %s1920_s30  ;;  %v659_v63 = vstv %s1658_s10  ;;  %s1690_s10 = sld [smem:[#allocation5 + $0x90]] }
  0x76   : > { %1356 = vrot.lane.b32.xlu0 %v1752_v0, %s1920_s30  ;;  %1320 = vrot.lane.b32.xlu1 %v1748_v1, %s1919_s29  ;;  %v721_v0 = vstv %s1667_s17  ;;  %s1689_s17 = sld [smem:[#allocation5 + $0x10]] }
  0x7a   : > { %1409 = vrot.lane.b32.xlu0 %v1760_v2, %s1919_s29  ;;  %1445 = vrot.lane.b32.xlu1 %v1764_v3, %s1920_s30  ;;  %s1646_s29 = sld [smem:[#allocation5 + $0x85]]  ;;  %v705_v3 = vstv %s1665_s20 }
  0x7b   : > { %s1654_s30 = sld [smem:[#allocation5 + $0x87]] }
  0x7c   : > { %s1691_s20 = sld [smem:[#allocation5 + $0x110]] }
  0x80   : > { %v570_v51 = vstv %s1646_s29  ;;  %s1677_s29 = sld [smem:[#allocation5 + $0xd]] }
  0x81   : > { %v623_v52 = vstv %s1654_s30  ;;  %s1678_s30 = sld [smem:[#allocation5 + $0x8d]] }
  0xc0   : > { %v428_v5 = vpop.permute.xlu0 %427  ;;  %v464_v6 = vpop.permute.xlu1 %463 }
  0xc1   : > { %v430_v7 = vmul.f32 %v428_v5, %v2165_v4  ;;  %v466_v9 = vmul.f32 %v464_v6, %v2165_v4  ;;  %v741_v5 = vstv %s1669_s22  ;;  %s1694_s22 = sld [smem:[#allocation5 + $0x91]] }
  0xc3   : > { %432 = vrot.lane.b32.xlu0 %v430_v7, %s1921_s4  ;;  %v438_v27 = vmul.f32 %v437_v23, %v430_v7  ;;  %v446_v31 = vmul.f32 %v445_v28, %v430_v7  ;;  %v474_v34 = vmul.f32 %v473_v32, %v466_v9  ;;  %v454_v37 = vmul.f32 %v453_v35, %v430_v7 }
  0xc4   : > { %v517_v10 = vpop.permute.xlu0 %516  ;;  %v553_v11 = vpop.permute.xlu1 %552  ;;  %v490_v38 = vmul.f32 %v489_v36, %v466_v9  ;;  %v482_v41 = vmul.f32 %v481_v39, %v466_v9  ;;  %v838_v23 = vstv %s1682_s7  ;;  %v891_v32 = vstv %s1690_s10  ;;  %s1705_s7 = sld [smem:[#allocation5 + $0x14]] }
  0xc5   : > { %v2173_v12 = vmul.f32 %v517_v10, %v2168_v8  ;;  %v2181_v14 = vmul.f32 %v553_v11, %v2168_v8  ;;  %v757_v10 = vstv %s1671_s26  ;;  %s1695_s26 = sld [smem:[#allocation5 + $0x111]] }
  0xc6   : > { %s1713_s10 = sld [smem:[#allocation5 + $0x16]] }
  0xc7   : > { %521 = vrot.lane.b32.xlu1 %v2173_v12, %s1921_s4  ;;  %468 = vrot.lane.b32.xlu0 %v466_v9, %s1922_s6  ;;  %v535_v42 = vmul.f32 %v534_v40, %v2173_v12  ;;  %v527_v45 = vmul.f32 %v526_v43, %v2173_v12  ;;  %v563_v46 = vmul.f32 %v562_v44, %v2181_v14  ;;  %v713_v9 = vstv %s1666_s25  ;;  %s1693_s25 = sld [smem:[#allocation5 + $0x11]] }
  0xc8   : > { %v606_v15 = vpop.permute.xlu0 %605  ;;  %v642_v16 = vpop.permute.xlu1 %641  ;;  %v543_v49 = vmul.f32 %v542_v47, %v2173_v12  ;;  %v579_v50 = vmul.f32 %v578_v48, %v2181_v14  ;;  %v571_v53 = vmul.f32 %v570_v51, %v2181_v14 }
  0xc9   : > { %v2184_v17 = vmul.f32 %v606_v15, %v2175_v13  ;;  %v2193_v19 = vmul.f32 %v642_v16, %v2175_v13  ;;  %v794_v15 = vstv %s1677_s29  ;;  %s1701_s29 = sld [smem:[#allocation5 + $0x13]] }
  0xcb   : > { %610 = vrot.lane.b32.xlu1 %v2184_v17, %s1921_s4  ;;  %557 = vrot.lane.b32.xlu0 %v2181_v14, %s1922_s6  ;;  %v624_v54 = vmul.f32 %v623_v52, %v2184_v17  ;;  %v616_v57 = vmul.f32 %v615_v55, %v2184_v17  ;;  %v652_v58 = vmul.f32 %v651_v56, %v2193_v19  ;;  %v749_v14 = vstv %s1670_s27  ;;  %s1702_s27 = sld [smem:[#allocation5 + $0x93]] }
  0xcc   : > { %v696_v20 = vpop.permute.xlu0 %695  ;;  %v732_v21 = vpop.permute.xlu1 %731  ;;  %v632_v61 = vmul.f32 %v631_v59, %v2184_v17  ;;  %v668_v62 = vmul.f32 %v667_v60, %v2193_v19  ;;  %v660_v1 = vmul.f32 %v659_v63, %v2193_v19  ;;  %v935_v51 = vstv %s1695_s26  ;;  %s2338_s26 = sld [smem:[#allocation5 + $0x99]] }
  0xcd   : > { %v2196_v22 = vmul.f32 %v696_v20, %v2186_v18  ;;  %v2203_v24 = vmul.f32 %v732_v21, %v2186_v18  ;;  %v810_v20 = vstv %s1679_s5  ;;  %v919_v44 = vstv %s1693_s25  ;;  %s1706_s5 = sld [smem:[#allocation5 + $0x94]] }
  0xce   : > { %s2328_s25 = sld [smem:[#allocation5 + $0x117]] }
  0xcf   : > { %700 = vrot.lane.b32.xlu1 %v2196_v22, %s1921_s4  ;;  %646 = vrot.lane.b32.xlu0 %v2193_v19, %s1922_s6  ;;  %v722_v2 = vmul.f32 %v721_v0, %v2196_v22  ;;  %v706_v6 = vmul.f32 %v705_v3, %v2196_v22  ;;  %v742_v7 = vmul.f32 %v741_v5, %v2203_v24  ;;  %v802_v19 = vstv %s1678_s30  ;;  %s1703_s30 = sld [smem:[#allocation5 + $0x113]] }
  0xd0   : > { %v785_v26 = vpop.permute.xlu1 %784  ;;  %v821_v30 = vpop.permute.xlu0 %820  ;;  %v714_v11 = vmul.f32 %v713_v9, %v2196_v22  ;;  %v758_v12 = vmul.f32 %v757_v10, %v2203_v24  ;;  %v750_v16 = vmul.f32 %v749_v14, %v2203_v24 }
  0xd1   : > { %v2211_v29 = vmul.f32 %v785_v26, %v2205_v25  ;;  %v2217_v33 = vmul.f32 %v821_v30, %v2205_v25  ;;  %v830_v26 = vstv %s1681_s8  ;;  %s1707_s8 = sld [smem:[#allocation5 + $0x114]] }
  0xd3   : > { %736 = vrot.lane.b32.xlu0 %v2203_v24, %s1922_s6  ;;  %440 = vrot.lane.b32.xlu1 %v438_v27, %s1921_s4  ;;  %v795_v17 = vmul.f32 %v794_v15, %v2211_v29  ;;  %v803_v21 = vmul.f32 %v802_v19, %v2211_v29  ;;  %v811_v22 = vmul.f32 %v810_v20, %v2211_v29  ;;  %v2267_v24 = vld [vmem:[#allocation2 + $0x12] sm:$0xff] }
  0xd4   : > { %v874_v27 = vpop.permute.xlu0 %873  ;;  %v839_v28 = vmul.f32 %v838_v23, %v2217_v33  ;;  %v831_v30 = vmul.f32 %v830_v26, %v2217_v33  ;;  %v910_v36 = vpop.permute.xlu1 %909  ;;  %v1636_v20 = vld [vmem:[%s2104_s19 + $0x18] sm:$0xff] }
  0xd5   : > { %v989_v60 = vstv %s1703_s30  ;;  %s2356_s30 = sld [smem:[#allocation5 + $0x119]] }
  0xd7   : > { %789 = vrot.lane.b32.xlu0 %v2211_v29, %s1921_s4  ;;  %448 = vrot.lane.b32.xlu1 %v446_v31, %s1921_s4  ;;  %v846_v31 = vstv %s1683_s9  ;;  %v876_v29 = vmul.f32 %v874_v27, %v2267_v24  ;;  %s1714_s9 = sld [smem:[#allocation5 + $0x96]]  ;;  %v1025_v9 = vstv %s1707_s8  ;;  %v2333_v27 = vmul.f32 %v1636_v20, %v2168_v8 }
  0xd8   : > { %v847_v35 = vmul.f32 %v846_v31, %v2217_v33  ;;  %v964_v40 = vpop.permute.xlu1 %963  ;;  %s2372_s8 = sld [smem:[#allocation5 + $0x100]] }
  0xdb   : > { %825 = vrot.lane.b32.xlu0 %v2217_v33, %s1922_s6  ;;  %476 = vrot.lane.b32.xlu1 %v474_v34, %s1922_s6  ;;  %v883_v34 = vstv %s1689_s17  ;;  %v927_v33 = vstv %s1694_s22  ;;  %s1715_s17 = sld [smem:[#allocation5 + $0x116]] }
  0xdc   : > { %v884_v39 = vmul.f32 %v883_v34, %v876_v29  ;;  %v2282_v48 = vpop.permute.xlu1 %1088  ;;  %s2318_s22 = sld [smem:[#allocation5 + $0x17]] }
  0xdd   : > { %v1070_v15 = vstv %s1714_s9  ;;  %s2378_s9 = sld [smem:[#allocation5 + $0x80]] }
  0xdf   : > { %456 = vrot.lane.b32.xlu0 %v454_v37, %s1921_s4  ;;  %492 = vrot.lane.b32.xlu1 %v490_v38, %s1922_s6  ;;  %v1000_v37 = vpop.permute.xlu0 %999  ;;  %v892_v38 = vmul.f32 %v891_v32, %v876_v29 }
  0xe0   : > { %v2291_v56 = vpop.permute.xlu1 %1141 }
  0xe1   : > { %v1078_v26 = vstv %s1715_s17  ;;  %s2386_s17 = sld [smem:[#allocation5 + $0x9c]] }
  0xe3   : > { %484 = vrot.lane.b32.xlu0 %v482_v41, %s1922_s6  ;;  %537 = vrot.lane.b32.xlu1 %v535_v42, %s1921_s4  ;;  %v899_v41 = vstv %s1691_s20  ;;  %v912_v42 = vmul.f32 %v910_v36, %v2267_v24  ;;  %v1053_v43 = vpop.permute.xlu0 %1052  ;;  %s2316_s20 = sld [smem:[#allocation5 + $0x97]]  ;;  %v1648_v36 = vld [vmem:[%s2104_s19 + $0x30] sm:$0xff] }
  0xe5   : > { %v920_v47 = vmul.f32 %v919_v44, %v912_v42  ;;  %v936_v55 = vmul.f32 %v935_v51, %v912_v42 }
  0xe7   : > { %529 = vrot.lane.b32.xlu0 %v527_v45, %s1921_s4  ;;  %565 = vrot.lane.b32.xlu1 %v563_v46, %s1922_s6  ;;  %v900_v45 = vmul.f32 %v899_v41, %v876_v29  ;;  %v928_v46 = vmul.f32 %v927_v33, %v912_v42  ;;  %v2351_v41 = vmul.f32 %v1648_v36, %v2175_v13  ;;  %v1114_v33 = vstv %s2328_s25  ;;  %s2401_s25 = sld [smem:[#allocation5 + $0x1c]] }
  0xe9   : > { %v1106_v34 = vstv %s2316_s20  ;;  %s2390_s20 = sld [smem:[#allocation5 + $0x3]] }
  0xeb   : > { %545 = vrot.lane.b32.xlu0 %v543_v49, %s1921_s4  ;;  %581 = vrot.lane.b32.xlu1 %v579_v50, %s1922_s6  ;;  %v2284_v49 = vld [vmem:[#allocation2 + $0x20] sm:$0xff]  ;;  %v2286_v50 = vpop.permute.xlu0 %1177 }
  0xec   : > { %v966_v52 = vmul.f32 %v964_v40, %v2284_v49 }
  0xee   : > { %v990_v63 = vmul.f32 %v989_v60, %v966_v52 }
  0xef   : > { %573 = vrot.lane.b32.xlu0 %v571_v53, %s1922_s6  ;;  %626 = vrot.lane.b32.xlu1 %v624_v54, %s1921_s4  ;;  %v981_v53 = vstv %s1702_s27  ;;  %v973_v54 = vstv %s1701_s29  ;;  %v2295_v59 = vpop.permute.xlu0 %1231  ;;  %s2342_s27 = sld [smem:[#allocation5 + $0x19]] }
  0xf0   : > { %s2348_s29 = sld [smem:[#allocation5]] }
  0xf3   : > { %618 = vrot.lane.b32.xlu0 %v616_v57, %s1921_s4  ;;  %654 = vrot.lane.b32.xlu1 %v652_v58, %s1922_s6  ;;  %v982_v57 = vmul.f32 %v981_v53, %v966_v52  ;;  %v974_v58 = vmul.f32 %v973_v54, %v966_v52  ;;  %v2302_v0 = vpop.permute.xlu0 %1356 }
  0xf5   : > { %v1151_v53 = vstv %s2342_s27  ;;  %s2414_s27 = sld [smem:[#allocation5 + $0x11c]] }
  0xf7   : > { %634 = vrot.lane.b32.xlu0 %v632_v61, %s1921_s4  ;;  %670 = vrot.lane.b32.xlu1 %v668_v62, %s1922_s6  ;;  %v2299_v61 = vpop.permute.xlu1 %1267  ;;  %v1002_v62 = vmul.f32 %v1000_v37, %v2284_v49  ;;  %v2312_v10 = vpop.permute.xlu0 %1409 }
  0xf9   : > { %v1026_v14 = vmul.f32 %v1025_v9, %v1002_v62 }
  0xfb   : > { %662 = vrot.lane.b32.xlu0 %v660_v1, %s1922_s6  ;;  %724 = vrot.lane.b32.xlu1 %v722_v2, %s1921_s4  ;;  %v1017_v1 = vstv %s1706_s5  ;;  %v1009_v2 = vstv %s1705_s7  ;;  %s2363_s5 = sld [smem:[#allocation5 + $0x9a]] }
  0xfc   : > { %v1018_v3 = vmul.f32 %v1017_v1, %v1002_v62  ;;  %v1010_v5 = vmul.f32 %v1009_v2, %v1002_v62  ;;  %s2368_s7 = sld [smem:[#allocation5 + $0x1a]]  ;;  %v1167_v1 = vstv %s2356_s30  ;;  %v1672_v2 = vld [vmem:[%s2104_s19 + $0x60] sm:$0xff] }
  0xfd   : > { %s2429_s30 = sld [smem:[#allocation5 + $0x1d]] }
  0xff   : > { %708 = vrot.lane.b32.xlu0 %v706_v6, %s1921_s4  ;;  %744 = vrot.lane.b32.xlu1 %v742_v7, %s1922_s6  ;;  %v2306_v6 = vpop.permute.xlu1 %1320  ;;  %v2308_v7 = vld [vmem:[#allocation2 + $0x21] sm:$0xff] }
 0x102   : > { %v1187_v20 = vstv %s2368_s7  ;;  %s2438_s7 = sld [smem:[#allocation5 + $0x86]] }
 0x103   : > { %716 = vrot.lane.b32.xlu0 %v714_v11, %s1921_s4  ;;  %760 = vrot.lane.b32.xlu1 %v758_v12, %s1922_s6  ;;  %v413_v11 = vld [vmem:[%s2104_s19] sm:$0xff]  ;;  %v1055_v12 = vmul.f32 %v1053_v43, %v2308_v7 }
 0x104   : > { %v2325_v19 = vmul.f32 %v413_v11, %v2165_v4 }
 0x107   : > { %752 = vrot.lane.b32.xlu0 %v750_v16, %s1922_s6  ;;  %797 = vrot.lane.b32.xlu1 %v795_v17, %s1921_s4  ;;  %v1062_v16 = vstv %s1713_s10  ;;  %v2322_v17 = vpop.permute.xlu1 %1445  ;;  %s2381_s10 = sld [smem:[#allocation5 + $0x11a]] }
 0x108   : > { %v1063_v23 = vmul.f32 %v1062_v16, %v1055_v12  ;;  %v1195_v16 = vstv %s2363_s5  ;;  %s2435_s5 = sld [smem:[#allocation5 + $0x6]] }
 0x10b   : > { %805 = vrot.lane.b32.xlu0 %v803_v21, %s1921_s4  ;;  %813 = vrot.lane.b32.xlu1 %v811_v22, %s1921_s4  ;;  %v1071_v22 = vmul.f32 %v1070_v15, %v1055_v12 }
 0x10f   : > { %841 = vrot.lane.b32.xlu0 %v839_v28, %s1922_s6  ;;  %833 = vrot.lane.b32.xlu1 %v831_v30, %s1922_s6  ;;  %v1091_v28 = vmul.f32 %v2282_v48, %v2308_v7 }
 0x111   : > { %v1115_v48 = vmul.f32 %v1114_v33, %v1091_v28 }
 0x113   : > { %878 = vrot.lane.b32.xlu0 %v876_v29, %s1921_s4  ;;  %849 = vrot.lane.b32.xlu1 %v847_v35, %s1922_s6  ;;  %v1079_v29 = vmul.f32 %v1078_v26, %v1055_v12  ;;  %v1098_v35 = vstv %s2318_s22  ;;  %s2394_s22 = sld [smem:[#allocation5 + $0x83]] }
 0x114   : > { %v1099_v40 = vmul.f32 %v1098_v35, %v1091_v28 }
 0x117   : > { %894 = vrot.lane.b32.xlu0 %v892_v38, %s1921_s4  ;;  %886 = vrot.lane.b32.xlu1 %v884_v39, %s1921_s4  ;;  %v1107_v39 = vmul.f32 %v1106_v34, %v1091_v28  ;;  %v1203_v34 = vstv %s2381_s10  ;;  %s2450_s10 = sld [smem:[#allocation5 + $0x106]] }
 0x11b   : > { %914 = vrot.lane.b32.xlu0 %v912_v42, %s1922_s6  ;;  %902 = vrot.lane.b32.xlu1 %v900_v45, %s1921_s4  ;;  %v2353_v42 = vld [vmem:[#allocation2 + $0x22] sm:$0xff] }
 0x11c   : > { %v1660_v45 = vld [vmem:[%s2104_s19 + $0x48] sm:$0xff] }
 0x11d   : > { %v2375_v54 = vmul.f32 %v1660_v45, %v2186_v18  ;;  %v1249_v45 = vstv %s2386_s17  ;;  %s2454_s17 = sld [smem:[#allocation5 + $0x1f]] }
 0x11f   : > { %930 = vrot.lane.b32.xlu0 %v928_v46, %s1922_s6  ;;  %922 = vrot.lane.b32.xlu1 %v920_v47, %s1922_s6  ;;  %v1144_v46 = vmul.f32 %v2291_v56, %v2353_v42 }
 0x123   : > { %968 = vrot.lane.b32.xlu0 %v966_v52, %s1921_s4  ;;  %938 = vrot.lane.b32.xlu1 %v936_v55, %s1922_s6  ;;  %v1159_v52 = vstv %s2338_s26  ;;  %s2407_s26 = sld [smem:[#allocation5 + $0x103]] }
 0x124   : > { %v1160_v60 = vmul.f32 %v1159_v52, %v1144_v46 }
 0x127   : > { %984 = vrot.lane.b32.xlu0 %v982_v57, %s1921_s4  ;;  %976 = vrot.lane.b32.xlu1 %v974_v58, %s1921_s4  ;;  %v416_v57 = vstv %s2348_s29  ;;  %s2423_s29 = sld [smem:[#allocation5 + $0x9d]] }
 0x12b   : > { %1004 = vrot.lane.b32.xlu0 %v1002_v62, %s1922_s6  ;;  %992 = vrot.lane.b32.xlu1 %v990_v63, %s1921_s4  ;;  %v1152_v62 = vmul.f32 %v1151_v53, %v1144_v46 }
 0x12f   : > { %1020 = vrot.lane.b32.xlu0 %v1018_v3, %s1922_s6  ;;  %1012 = vrot.lane.b32.xlu1 %v1010_v5, %s1922_s6  ;;  %v417_v3 = vmul.f32 %v416_v57, %v2325_v19  ;;  %v1180_v5 = vmul.f32 %v2286_v50, %v2353_v42  ;;  %v1257_v57 = vstv %s2414_s27  ;;  %s2480_s27 = sld [smem:[#allocation5 + $0x20]] }
 0x133   : > { %1057 = vrot.lane.b32.xlu0 %v1055_v12, %s1921_s4  ;;  %1028 = vrot.lane.b32.xlu1 %v1026_v14, %s1922_s6  ;;  %v1168_v12 = vmul.f32 %v1167_v1, %v1144_v46  ;;  %v2397_v14 = vmul.f32 %v1672_v2, %v2205_v25  ;;  %v2409_v25 = vld [vmem:[#allocation2 + $0x30] sm:$0xff] }
 0x135   : > { %v433_v21 = vpop.permute.xlu0 %432 }
 0x136   : > { %v435_v4 = vadd.f32 %v433_v21, %v2325_v19  ;;  %v422_v21 = vstv %s2372_s8  ;;  %s2441_s8 = sld [smem:[#allocation5 + $0x11d]] }
 0x137   : > { %1073 = vrot.lane.b32.xlu0 %v1071_v22, %s1921_s4  ;;  %1065 = vrot.lane.b32.xlu1 %v1063_v23, %s1921_s4  ;;  %v419_v23 = vstv %s2378_s9  ;;  %s2446_s9 = sld [smem:[#allocation5 + $0x9f]] }
 0x138   : > { %v420_v36 = vmul.f32 %v419_v23, %v2325_v19 }
 0x139   : > { %v522_v30 = vpop.permute.xlu1 %521  ;;  %v469_v31 = vpop.permute.xlu0 %468 }
 0x13a   : > { %v471_v32 = vadd.f32 %v469_v31, %v435_v4 }
 0x13b   : > { %1093 = vrot.lane.b32.xlu0 %v1091_v28, %s1922_s6  ;;  %1081 = vrot.lane.b32.xlu1 %v1079_v29, %s1921_s4  ;;  %v1196_v28 = vmul.f32 %v1195_v16, %v1180_v5 }
 0x13c   : > { %v500_v8 = vadd.f32 %v2333_v27, %v471_v32  ;;  %v423_v32 = vmul.f32 %v422_v21, %v2325_v19  ;;  %v595_v21 = vstv %s2438_s7  ;;  %s2498_s7 = sld [smem:[#allocation5 + $0xc]] }
 0x13d   : > { %v611_v37 = vpop.permute.xlu1 %610  ;;  %v558_v38 = vpop.permute.xlu0 %557 }
 0x13e   : > { %v524_v43 = vadd.f32 %v522_v30, %v500_v8  ;;  %v1188_v30 = vmul.f32 %v1187_v20, %v1180_v5  ;;  %v1234_v8 = vmul.f32 %v2295_v59, %v2409_v25 }
 0x13f   : > { %1109 = vrot.lane.b32.xlu0 %v1107_v39, %s1922_s6  ;;  %1101 = vrot.lane.b32.xlu1 %v1099_v40, %s1922_s6  ;;  %v1204_v39 = vmul.f32 %v1203_v34, %v1180_v5  ;;  %v506_v40 = vstv %s2394_s22  ;;  %s2467_s22 = sld [smem:[#allocation5 + $0x109]] }
 0x140   : > { %v560_v44 = vadd.f32 %v558_v38, %v524_v43  ;;  %v502_v43 = vstv %s2390_s20  ;;  %v1250_v52 = vmul.f32 %v1249_v45, %v1234_v8  ;;  %s2463_s20 = sld [smem:[#allocation5 + $0x11f]] }
 0x141   : > { %v701_v47 = vpop.permute.xlu1 %700  ;;  %v647_v13 = vpop.permute.xlu0 %646 }
 0x142   : > { %v589_v51 = vadd.f32 %v2351_v41, %v560_v44 }
 0x143   : > { %1146 = vrot.lane.b32.xlu0 %v1144_v46, %s1921_s4  ;;  %1117 = vrot.lane.b32.xlu1 %v1115_v48, %s1922_s6  ;;  %v1241_v46 = vstv %s2401_s25  ;;  %s2471_s25 = sld [smem:[#allocation5 + $0xa0]] }
 0x144   : > { %v613_v55 = vadd.f32 %v611_v37, %v589_v51  ;;  %v1242_v53 = vmul.f32 %v1241_v46, %v1234_v8 }
 0x145   : > { %v737_v56 = vpop.permute.xlu0 %736  ;;  %v441_v58 = vpop.permute.xlu1 %440 }
 0x146   : > { %v649_v63 = vadd.f32 %v647_v13, %v613_v55  ;;  %v443_v22 = vadd.f32 %v441_v58, %v417_v3  ;;  %v503_v13 = vmul.f32 %v502_v43, %v2333_v27  ;;  %v510_v55 = vstv %s2407_s26  ;;  %s2476_s26 = sld [smem:[#allocation5 + $0x9]] }
 0x147   : > { %1162 = vrot.lane.b32.xlu0 %v1160_v60, %s1921_s4  ;;  %1154 = vrot.lane.b32.xlu1 %v1152_v62, %s1921_s4  ;;  %v511_v62 = vmul.f32 %v510_v55, %v2333_v27 }
 0x148   : > { %v679_v18 = vadd.f32 %v2375_v54, %v649_v63  ;;  %v1270_v63 = vmul.f32 %v2299_v61, %v2409_v25 }
 0x149   : > { %v790_v9 = vpop.permute.xlu0 %789  ;;  %v449_v11 = vpop.permute.xlu1 %448 }
 0x14a   : > { %v703_v15 = vadd.f32 %v701_v47, %v679_v18  ;;  %v451_v59 = vadd.f32 %v449_v11, %v420_v36  ;;  %v507_v47 = vmul.f32 %v506_v40, %v2333_v27  ;;  %v1258_v18 = vmul.f32 %v1257_v57, %v1234_v8 }
 0x14b   : > { %1182 = vrot.lane.b32.xlu0 %v1180_v5, %s1922_s6  ;;  %1170 = vrot.lane.b32.xlu1 %v1168_v12, %s1921_s4  ;;  %v1277_v11 = vstv %s2429_s30  ;;  %s2488_s30 = sld [smem:[#allocation5 + $0x120]] }
 0x14c   : > { %v739_v50 = vadd.f32 %v737_v56, %v703_v15  ;;  %v1278_v20 = vmul.f32 %v1277_v11, %v1270_v63  ;;  %v681_v55 = vstv %s2476_s26  ;;  %s2542_s26 = sld [smem:[#allocation5 + $0x8f]] }
 0x14d   : > { %v826_v26 = vpop.permute.xlu0 %825  ;;  %v477_v4 = vpop.permute.xlu1 %476 }
 0x14e   : > { %v768_v31 = vadd.f32 %v2397_v14, %v739_v50  ;;  %v479_v29 = vadd.f32 %v477_v4, %v443_v22  ;;  %v591_v50 = vstv %s2435_s5  ;;  %v2460_v22 = vld [vmem:[#allocation2 + $0x31] sm:$0xff]  ;;  %s2493_s5 = sld [smem:[#allocation5 + $0xa2]] }
 0x14f   : > { %1198 = vrot.lane.b32.xlu0 %v1196_v28, %s1922_s6  ;;  %1190 = vrot.lane.b32.xlu1 %v1188_v30, %s1922_s6  ;;  %v596_v28 = vmul.f32 %v595_v21, %v2351_v41  ;;  %v592_v30 = vmul.f32 %v591_v50, %v2351_v41 }
 0x150   : > { %v792_v35 = vadd.f32 %v790_v9, %v768_v31  ;;  %v504_v60 = vadd.f32 %v503_v13, %v479_v29  ;;  %v1285_v9 = vstv %s2423_s29  ;;  %v1323_v31 = vmul.f32 %v2306_v6, %v2460_v22  ;;  %s2485_s29 = sld [smem:[#allocation5 + $0x89]] }
 0x151   : > { %v457_v37 = vpop.permute.xlu0 %456  ;;  %v493_v38 = vpop.permute.xlu1 %492  ;;  %v1286_v16 = vmul.f32 %v1285_v9, %v1270_v63 }
 0x152   : > { %v2425_v33 = vadd.f32 %v826_v26, %v792_v35  ;;  %v459_v44 = vadd.f32 %v457_v37, %v423_v32  ;;  %v1293_v26 = vstv %s2441_s8  ;;  %v599_v35 = vstv %s2450_s10  ;;  %s2503_s8 = sld [smem:[#allocation5 + $0x22]] }
 0x153   : > { %1236 = vrot.lane.b32.xlu0 %v1234_v8, %s1921_s4  ;;  %1206 = vrot.lane.b32.xlu1 %v1204_v39, %s1922_s6  ;;  %v1294_v34 = vmul.f32 %v1293_v26, %v1270_v63  ;;  %v1338_v8 = vstv %s2446_s9  ;;  %v1330_v37 = vstv %s2454_s17  ;;  %v600_v6 = vmul.f32 %v599_v35, %v2351_v41  ;;  %s2508_s9 = sld [smem:[#allocation5 + $0x10c]] }
 0x154   : > { %v495_v19 = vadd.f32 %v493_v38, %v459_v44  ;;  %v1339_v44 = vmul.f32 %v1338_v8, %v1323_v31  ;;  %v1331_v45 = vmul.f32 %v1330_v37, %v1323_v31  ;;  %s2511_s10 = sld [smem:[#allocation5 + $0x8c]] }
 0x155   : > { %v485_v48 = vpop.permute.xlu0 %484  ;;  %v538_v51 = vpop.permute.xlu1 %537  ;;  %s2516_s17 = sld [smem:[#allocation5 + $0x122]] }
 0x156   : > { %v487_v56 = vadd.f32 %v485_v48, %v451_v59  ;;  %v512_v61 = vadd.f32 %v511_v62, %v495_v19  ;;  %v1346_v19 = vstv %s2463_s20  ;;  %v1359_v48 = vmul.f32 %v2302_v0, %v2460_v22  ;;  %s2524_s20 = sld [smem:[#allocation5 + $0xa3]] }
 0x157   : > { %1252 = vrot.lane.b32.xlu0 %v1250_v52, %s1921_s4  ;;  %1244 = vrot.lane.b32.xlu1 %v1242_v53, %s1921_s4  ;;  %v1347_v53 = vmul.f32 %v1346_v19, %v1323_v31  ;;  %v682_v62 = vmul.f32 %v681_v55, %v2375_v54 }
 0x158   : > { %v508_v58 = vadd.f32 %v507_v47, %v487_v56  ;;  %v689_v47 = vstv %s2467_s22  ;;  %s2528_s22 = sld [smem:[#allocation5 + $0x23]] }
 0x159   : > { %v530_v1 = vpop.permute.xlu0 %529  ;;  %v566_v2 = vpop.permute.xlu1 %565  ;;  %v690_v57 = vmul.f32 %v689_v47, %v2375_v54 }
 0x15a   : > { %v540_v3 = vadd.f32 %v538_v51, %v508_v58  ;;  %v532_v5 = vadd.f32 %v530_v1, %v504_v60  ;;  %v1374_v58 = vstv %s2471_s25  ;;  %v1366_v60 = vstv %s2480_s27  ;;  %s2536_s25 = sld [smem:[#allocation5 + $0x123]] }
 0x15b   : > { %1272 = vrot.lane.b32.xlu0 %v1270_v63, %s1922_s6  ;;  %1260 = vrot.lane.b32.xlu1 %v1258_v18, %s1921_s4  ;;  %v1367_v18 = vmul.f32 %v1366_v60, %v1359_v48  ;;  %v774_v35 = vstv %s2511_s10  ;;  %s2546_s27 = sld [smem:[#allocation5 + $0xf]] }
 0x15c   : > { %v568_v27 = vadd.f32 %v566_v2, %v532_v5  ;;  %v1375_v2 = vmul.f32 %v1374_v58, %v1359_v48  ;;  %v2513_v5 = vld [vmem:[#allocation2 + $0x32] sm:$0xff]  ;;  %v1463_v47 = vstv %s2524_s20  ;;  %s1721_s10 = sld [smem:[#allocation5 + $0x18]] }
 0x15d   : > { %v546_v12 = vpop.permute.xlu0 %545  ;;  %v582_v15 = vpop.permute.xlu1 %581  ;;  %s1734_s20 = sld [smem:[#allocation5 + $0x9b]] }
 0x15e   : > { %v548_v23 = vadd.f32 %v546_v12, %v512_v61  ;;  %v593_v39 = vadd.f32 %v592_v30, %v568_v27  ;;  %v1382_v27 = vstv %s2488_s30  ;;  %s1697_s30 = sld [smem:[#allocation5 + $0x12]] }
 0x15f   : > { %1288 = vrot.lane.b32.xlu0 %v1286_v16, %s1922_s6  ;;  %1280 = vrot.lane.b32.xlu1 %v1278_v20, %s1922_s6  ;;  %v1412_v16 = vmul.f32 %v2312_v10, %v2513_v5  ;;  %v1383_v50 = vmul.f32 %v1382_v27, %v1359_v48 }
 0x160   : > { %v584_v4 = vadd.f32 %v582_v15, %v548_v23  ;;  %v770_v23 = vstv %s2498_s7  ;;  %s1709_s7 = sld [smem:[#allocation5 + $0x15]] }
 0x161   : > { %v574_v29 = vpop.permute.xlu0 %573  ;;  %v627_v32 = vpop.permute.xlu1 %626  ;;  %v771_v30 = vmul.f32 %v770_v23, %v2397_v14 }
 0x162   : > { %v576_v36 = vadd.f32 %v574_v29, %v540_v3  ;;  %v601_v13 = vadd.f32 %v600_v6, %v584_v4  ;;  %v685_v3 = vstv %s2485_s29  ;;  %v1427_v4 = vstv %s2493_s5  ;;  %s1687_s29 = sld [smem:[#allocation5 + $0x10f]] }
 0x163   : > { %1325 = vrot.lane.b32.xlu0 %v1323_v31, %s1921_s4  ;;  %1296 = vrot.lane.b32.xlu1 %v1294_v34, %s1922_s6  ;;  %v686_v15 = vmul.f32 %v685_v3, %v2375_v54  ;;  %v775_v6 = vmul.f32 %v774_v35, %v2397_v14  ;;  %s1699_s5 = sld [smem:[#allocation5 + $0x112]] }
 0x164   : > { %v597_v38 = vadd.f32 %v596_v28, %v576_v36  ;;  %v1419_v28 = vstv %s2503_s8  ;;  %v778_v36 = vstv %s2508_s9  ;;  %s1711_s8 = sld [smem:[#allocation5 + $0x115]] }
 0x165   : > { %v619_v40 = vpop.permute.xlu0 %618  ;;  %v655_v43 = vpop.permute.xlu1 %654  ;;  %v1420_v34 = vmul.f32 %v1419_v28, %v1412_v16  ;;  %s1722_s9 = sld [smem:[#allocation5 + $0x98]] }
 0x166   : > { %v629_v46 = vadd.f32 %v627_v32, %v597_v38  ;;  %v621_v59 = vadd.f32 %v619_v40, %v593_v39  ;;  %v1428_v32 = vmul.f32 %v1427_v4, %v1412_v16  ;;  %v1435_v38 = vstv %s2516_s17  ;;  %s1723_s17 = sld [smem:[#allocation5 + $0x118]] }
 0x167   : > { %1341 = vrot.lane.b32.xlu0 %v1339_v44, %s1921_s4  ;;  %1333 = vrot.lane.b32.xlu1 %v1331_v45, %s1921_s4  ;;  %v779_v40 = vmul.f32 %v778_v36, %v2397_v14 }
 0x168   : > { %v657_v41 = vadd.f32 %v655_v43, %v621_v59  ;;  %v1448_v43 = vmul.f32 %v2322_v17, %v2513_v5 }
 0x169   : > { %v635_v51 = vpop.permute.xlu0 %634  ;;  %v671_v52 = vpop.permute.xlu1 %670 }
 0x16a   : > { %v637_v56 = vadd.f32 %v635_v51, %v601_v13  ;;  %v683_v12 = vadd.f32 %v682_v62, %v657_v41  ;;  %v1455_v41 = vstv %s2528_s22  ;;  %s1733_s22 = sld [smem:[#allocation5 + $0x1b]] }
 0x16b   : > { %1361 = vrot.lane.b32.xlu0 %v1359_v48, %s1922_s6  ;;  %1349 = vrot.lane.b32.xlu1 %v1347_v53, %s1921_s4  ;;  %v1684_v48 = vld [vmem:[%s2104_s19 + $0x78] sm:$0xff]  ;;  %v1456_v53 = vmul.f32 %v1455_v41, %v1448_v43 }
 0x16c   : > { %v673_v0 = vadd.f32 %v671_v52, %v637_v56  ;;  %v1464_v52 = vmul.f32 %v1463_v47, %v1448_v43  ;;  %v856_v58 = vmul.f32 %v1684_v48, %v2267_v24  ;;  %v1708_v47 = vld [vmem:[%s2104_s19 + $0xa8] sm:$0xff] }
 0x16d   : > { %v663_v63 = vpop.permute.xlu0 %662  ;;  %v725_v1 = vpop.permute.xlu1 %724 }
 0x16e   : > { %v665_v9 = vadd.f32 %v663_v63, %v629_v46  ;;  %v691_v11 = vadd.f32 %v690_v57, %v673_v0  ;;  %v1436_v46 = vmul.f32 %v1435_v38, %v1412_v16  ;;  %v1471_v57 = vstv %s2536_s25  ;;  %s1735_s25 = sld [smem:[#allocation5 + $0x11b]] }
 0x16f   : > { %1377 = vrot.lane.b32.xlu0 %v1375_v2, %s1922_s6  ;;  %1369 = vrot.lane.b32.xlu1 %v1367_v18, %s1922_s6  ;;  %v1472_v62 = vmul.f32 %v1471_v57, %v1448_v43  ;;  %v863_v63 = vstv %s2542_s26  ;;  %v857_v3 = vadd.f32 %v856_v58, %v2425_v33  ;;  %s1746_s26 = sld [smem:[#allocation5 + $0x9e]] }
 0x170   : > { %v727_v61 = vadd.f32 %v725_v1, %v691_v11  ;;  %v687_v10 = vadd.f32 %v686_v15, %v665_v9  ;;  %v859_v1 = vstv %s2546_s27  ;;  %v864_v9 = vmul.f32 %v863_v63, %v856_v58  ;;  %s1745_s27 = sld [smem:[#allocation5 + $0x1e]] }
 0x171   : > { %v709_v20 = vpop.permute.xlu0 %708  ;;  %v745_v21 = vpop.permute.xlu1 %744  ;;  %v860_v11 = vmul.f32 %v859_v1, %v856_v58  ;;  %v1046_v1 = vstv %s1711_s8 }
 0x172   : > { %v711_v26 = vadd.f32 %v709_v20, %v683_v12  ;;  %v867_v12 = vstv %s1687_s29  ;;  %s1747_s29 = sld [smem:[#allocation5 + $0x11e]] }
 0x173   : > { %1414 = vrot.lane.b32.xlu0 %v1412_v16, %s1921_s4  ;;  %1385 = vrot.lane.b32.xlu1 %v1383_v50, %s1922_s6  ;;  %v1696_v50 = vld [vmem:[%s2104_s19 + $0x90] sm:$0xff] }
 0x174   : > { %v747_v54 = vadd.f32 %v745_v21, %v711_v26  ;;  %v868_v21 = vmul.f32 %v867_v12, %v856_v58  ;;  %v946_v33 = vmul.f32 %v1696_v50, %v2284_v49 }
 0x175   : > { %v717_v31 = vpop.permute.xlu0 %716  ;;  %v761_v29 = vpop.permute.xlu1 %760 }
 0x176   : > { %v719_v8 = vadd.f32 %v717_v31, %v687_v10  ;;  %v763_v37 = vadd.f32 %v761_v29, %v727_v61  ;;  %v772_v39 = vadd.f32 %v771_v30, %v747_v54  ;;  %v949_v29 = vstv %s1697_s30  ;;  %s1757_s30 = sld [smem:[#allocation5 + $0x21]] }
 0x177   : > { %1430 = vrot.lane.b32.xlu0 %v1428_v32, %s1921_s4  ;;  %1422 = vrot.lane.b32.xlu1 %v1420_v34, %s1921_s4 }
 0x178   : > { %v780_v13 = vadd.f32 %v779_v40, %v763_v37 }
 0x179   : > { %v753_v44 = vpop.permute.xlu0 %752  ;;  %v798_v45 = vpop.permute.xlu1 %797 }
 0x17a   : > { %v755_v59 = vadd.f32 %v753_v44, %v719_v8  ;;  %v800_v19 = vadd.f32 %v798_v45, %v772_v39  ;;  %v950_v8 = vmul.f32 %v949_v29, %v946_v33  ;;  %v957_v39 = vstv %s1699_s5  ;;  %s1759_s5 = sld [smem:[#allocation5 + $0x121]] }
 0x17b   : > { %1450 = vrot.lane.b32.xlu0 %v1448_v43, %s1922_s6  ;;  %1438 = vrot.lane.b32.xlu1 %v1436_v46, %s1921_s4  ;;  %s1698_s4 = sld [smem:[#allocation5 + $0x92]]  ;;  %v958_v45 = vmul.f32 %v957_v39, %v946_v33 }
 0x17c   : > { %v776_v14 = vadd.f32 %v775_v6, %v755_v59 }
 0x17d   : > { %v806_v17 = vpop.permute.xlu0 %805  ;;  %v814_v51 = vpop.permute.xlu1 %813 }
 0x17e   : > { %v808_v55 = vadd.f32 %v806_v17, %v776_v14  ;;  %v816_v56 = vadd.f32 %v814_v51, %v780_v13  ;;  %v1035_v13 = vmul.f32 %v1708_v47, %v2308_v7  ;;  %v1221_v47 = vstv %s1734_s20 }
 0x17f   : > { %1466 = vrot.lane.b32.xlu0 %v1464_v52, %s1922_s6  ;;  %1458 = vrot.lane.b32.xlu1 %v1456_v53, %s1922_s6  ;;  %v1038_v53 = vstv %s1709_s7 }
 0x181   : > { %v842_v60 = vpop.permute.xlu0 %841  ;;  %v834_v0 = vpop.permute.xlu1 %833  ;;  %v953_v31 = vstv %s1698_s4  ;;  %s1758_s4 = sld [smem:[#allocation5 + $0xa1]] }
 0x182   : > { %v844_v2 = vadd.f32 %v842_v60, %v808_v55  ;;  %v836_v18 = vadd.f32 %v834_v0, %v800_v19  ;;  %v954_v36 = vmul.f32 %v953_v31, %v946_v33  ;;  %v1039_v0 = vmul.f32 %v1038_v53, %v1035_v13 }
 0x183   : > { %1474 = vrot.lane.b32.xlu1 %v1472_v62, %s1922_s6  ;;  %s1710_s6 = sld [smem:[#allocation5 + $0x95]] }
 0x184   : > { %v865_v16 = vadd.f32 %v864_v9, %v844_v2  ;;  %v861_v20 = vadd.f32 %v860_v11, %v836_v18  ;;  %v1047_v11 = vmul.f32 %v1046_v1, %v1035_v13 }
 0x185   : > { %v879_v27 = vpop.permute.xlu0 %878  ;;  %v850_v61 = vpop.permute.xlu1 %849 }
 0x186   : > { %v881_v24 = vadd.f32 %v879_v27, %v857_v3  ;;  %v852_v15 = vadd.f32 %v850_v61, %v816_v56 }
 0x188   : > { %v869_v54 = vadd.f32 %v868_v21, %v852_v15  ;;  %v1720_v15 = vld [vmem:[%s2104_s19 + $0xc0] sm:$0xff] }
 0x189   : > { %v895_v23 = vpop.permute.xlu0 %894  ;;  %v887_v26 = vpop.permute.xlu1 %886  ;;  %v1042_v17 = vstv %s1710_s6  ;;  %v1124_v21 = vmul.f32 %v1720_v15, %v2353_v42  ;;  %s1511_s6 = sshll.u32 %s2115_s28, 4  ;;  %s2586_s6 = int_to_ptr.vmem [resolvable:$true] %s1511_s6 }
 0x18a   : > { %v897_v4 = vadd.f32 %v895_v23, %v865_v16  ;;  %v889_v28 = vadd.f32 %v887_v26, %v861_v20  ;;  %v1043_v56 = vmul.f32 %v1042_v17, %v1035_v13  ;;  %v1131_v23 = vstv %s1722_s9  ;;  %s1499_s9 = scalar_lea.sflag [#allocation6], %s2101_s11 }
 0x18d   : > { %v915_v10 = vpop.permute.xlu0 %914  ;;  %v903_v30 = vpop.permute.xlu1 %902 }
 0x18e   : > { %v917_v32 = vadd.f32 %v915_v10, %v881_v24  ;;  %v905_v34 = vadd.f32 %v903_v30, %v869_v54  ;;  %v1132_v54 = vmul.f32 %v1131_v23, %v1124_v21 }
 0x190   : > { %v947_v35 = vadd.f32 %v946_v33, %v917_v32 }
 0x191   : > { %v931_v37 = vpop.permute.xlu0 %930  ;;  %v923_v38 = vpop.permute.xlu1 %922 }
 0x192   : > { %v933_v6 = vadd.f32 %v931_v37, %v897_v4  ;;  %v925_v40 = vadd.f32 %v923_v38, %v889_v28  ;;  %v1127_v28 = vstv %s1721_s10  ;;  %s1850_s10 = scalar_lea.vmem %s2586_s6, 512 }
 0x193   : > { %v1128_v29 = vmul.f32 %v1127_v28, %v1124_v21  ;;  %p1851_p5 = scmp.ne.s32.totalorder %s2586_s6, %s1850_s10 }
 0x194   : > { %v955_v43 = vadd.f32 %v954_v36, %v933_v6  ;;  %v951_v44 = vadd.f32 %v950_v8, %v925_v40 }
 0x195   : > { %v969_v49 = vpop.permute.xlu0 %968  ;;  %v939_v46 = vpop.permute.xlu1 %938  ;;  %p1852_p11 = pnand %p1851_p5, %p2640_p10 }
 0x196   : > { %v941_v59 = vadd.f32 %v939_v46, %v905_v34  ;;  %v971_v48 = vadd.f32 %v969_v49, %v947_v35  ;;  %v1135_v35 = vstv %s1723_s17  ;;  %s1923_s17 = smov [#allocation8]  }
 0x197   : > { %v1136_v39 = vmul.f32 %v1135_v35, %v1124_v21  ;;  %p1853_p12 = pneg %p1852_p11  ;;  %s1854_s20 = sshll.u32 %s1923_s17, 4  ;;  %s1855_s20 = int_to_ptr.vmem [resolvable:$false] %s1854_s20 }
 0x198   : > { %v959_v19 = vadd.f32 %v958_v45, %v941_v59  ;;  %v1732_v45 = vld [vmem:[%s2104_s19 + $0xd8] sm:$0xff]  ;;  %p1857_p13 = scmp.lt.s32.totalorder %s2586_s6, %s1855_s20 }
 0x199   : > { %v985_v41 = vpop.permute.xlu0 %984  ;;  %v977_v14 = vpop.permute.xlu1 %976  ;;  %v1214_v59 = vmul.f32 %v1732_v45, %v2409_v25 }
 0x19a   : > { %v987_v57 = vadd.f32 %v985_v41, %v955_v43  ;;  %v979_v58 = vadd.f32 %v977_v14, %v951_v44 }
 0x19b   : > { %v1222_v17 = vmul.f32 %v1221_v47, %v1214_v59 }
 0x19d   : > { %v1005_v51 = vpop.permute.xlu0 %1004  ;;  %v993_v52 = vpop.permute.xlu1 %992 }
 0x19e   : > { %v1007_v55 = vadd.f32 %v1005_v51, %v971_v48  ;;  %v995_v3 = vadd.f32 %v993_v52, %v959_v19 }
 0x1a0   : > { %v1036_v60 = vadd.f32 %v1035_v13, %v1007_v55  ;;  %v1217_v13 = vstv %s1733_s22  ;;  %s1856_s22 = scalar_lea.vmem %s1855_s20, 1024 }
 0x1a1   : > { %v1021_v62 = vpop.permute.xlu0 %1020  ;;  %v1013_v63 = vpop.permute.xlu1 %1012  ;;  %v1218_v55 = vmul.f32 %v1217_v13, %v1214_v59  ;;  %p1858_p0 = scmp.lt.s32.totalorder %s1856_s22, %s1850_s10 }
 0x1a2   : > { %v1023_v2 = vadd.f32 %v1021_v62, %v987_v57  ;;  %v1015_v18 = vadd.f32 %v1013_v63, %v979_v58  ;;  %v1225_v58 = vstv %s1735_s25 }
 0x1a3   : > { %v1226_v1 = vmul.f32 %v1225_v58, %v1214_v59  ;;  %p1859_p1 = por %p1858_p0, %p1857_p13 }
 0x1a4   : > { %v1044_v9 = vadd.f32 %v1043_v56, %v1023_v2  ;;  %v1040_v7 = vadd.f32 %v1039_v0, %v1015_v18 }
 0x1a5   : > { %v1058_v27 = vpop.permute.xlu0 %1057  ;;  %v1029_v61 = vpop.permute.xlu1 %1028  ;;  %p1860_p2 = pnand %p1859_p1, %p1853_p12 }
 0x1a6   : > { %v1031_v12 = vadd.f32 %v1029_v61, %v995_v3  ;;  %v1060_v50 = vadd.f32 %v1058_v27, %v1036_v60 }
 0x1a8   : > { %v1048_v24 = vadd.f32 %v1047_v11, %v1031_v12 }
 0x1a9   : > { %v1074_v16 = vpop.permute.xlu0 %1073  ;;  %v1066_v20 = vpop.permute.xlu1 %1065 }
 0x1aa   : > { %v1076_v10 = vadd.f32 %v1074_v16, %v1044_v9  ;;  %v1068_v30 = vadd.f32 %v1066_v20, %v1040_v7  ;;  %v1744_v7 = vld [vmem:[%s2104_s19 + $0xf0] sm:$0xff]  ;;  %v1306_v20 = vstv %s1745_s27 }
 0x1ab   : > { %v1303_v61 = vmul.f32 %v1744_v7, %v2460_v22 }
 0x1ad   : > { %v1094_v26 = vpop.permute.xlu0 %1093  ;;  %v1082_v4 = vpop.permute.xlu1 %1081  ;;  %v1307_v28 = vmul.f32 %v1306_v20, %v1303_v61 }
 0x1ae   : > { %v1096_v33 = vadd.f32 %v1094_v26, %v1060_v50  ;;  %v1084_v37 = vadd.f32 %v1082_v4, %v1048_v24  ;;  %v1310_v24 = vstv %s1746_s26 }
 0x1af   : > { %v1311_v50 = vmul.f32 %v1310_v24, %v1303_v61 }
 0x1b0   : > { %v1125_v31 = vadd.f32 %v1124_v21, %v1096_v33 }
 0x1b1   : > { %v1110_v32 = vpop.permute.xlu0 %1109  ;;  %v1102_v34 = vpop.permute.xlu1 %1101 }
 0x1b2   : > { %v1112_v36 = vadd.f32 %v1110_v32, %v1076_v10  ;;  %v1104_v8 = vadd.f32 %v1102_v34, %v1068_v30  ;;  %v1314_v10 = vstv %s1747_s29 }
 0x1b3   : > { %v1315_v34 = vmul.f32 %v1314_v10, %v1303_v61 }
 0x1b4   : > { %v1133_v38 = vadd.f32 %v1132_v54, %v1112_v36  ;;  %v1129_v42 = vadd.f32 %v1128_v29, %v1104_v8 }
 0x1b5   : > { %v1147_v6 = vpop.permute.xlu0 %1146  ;;  %v1118_v40 = vpop.permute.xlu1 %1117 }
 0x1b6   : > { %v1120_v43 = vadd.f32 %v1118_v40, %v1084_v37  ;;  %v1149_v19 = vadd.f32 %v1147_v6, %v1125_v31 }
 0x1b8   : > { %v1137_v44 = vadd.f32 %v1136_v39, %v1120_v43  ;;  %v1399_v43 = vstv %s1758_s4 }
 0x1b9   : > { %v1163_v49 = vpop.permute.xlu0 %1162  ;;  %v1155_v46 = vpop.permute.xlu1 %1154 }
 0x1ba   : > { %v1165_v51 = vadd.f32 %v1163_v49, %v1133_v38  ;;  %v1157_v52 = vadd.f32 %v1155_v46, %v1129_v42  ;;  %v1756_v38 = vld [vmem:[%s2104_s19 + $0x108] sm:$0xff]  ;;  %v1395_v49 = vstv %s1757_s30  ;;  %s1772_s19 = sshll.u32 %s1968_s16, 7 }
 0x1bb   : > { %v1392_v6 = vmul.f32 %v1756_v38, %v2513_v5  ;;  %s2584_s16 = scalar_lea.hbm %s2634_s3, %s1772_s19 }
 0x1bd   : > { %v1183_v41 = vpop.permute.xlu0 %1182  ;;  %v1171_v14 = vpop.permute.xlu1 %1170 }
 0x1be   : > { %v1185_v48 = vadd.f32 %v1183_v41, %v1149_v19  ;;  %v1173_v62 = vadd.f32 %v1171_v14, %v1137_v44  ;;  %v1396_v14 = vmul.f32 %v1395_v49, %v1392_v6 }
 0x1c0   : > { %v1215_v53 = vadd.f32 %v1214_v59, %v1185_v48  ;;  %v1400_v59 = vmul.f32 %v1399_v43, %v1392_v6 }
 0x1c1   : > { %v1199_v56 = vpop.permute.xlu0 %1198  ;;  %v1191_v57 = vpop.permute.xlu1 %1190 }
 0x1c2   : > { %v1201_v60 = vadd.f32 %v1199_v56, %v1165_v51  ;;  %v1193_v0 = vadd.f32 %v1191_v57, %v1157_v52 }
 0x1c4   : > { %v1223_v63 = vadd.f32 %v1222_v17, %v1201_v60  ;;  %v1219_v25 = vadd.f32 %v1218_v55, %v1193_v0  ;;  %v1403_v17 = vstv %s1759_s5 }
 0x1c5   : > { %v1237_v2 = vpop.permute.xlu0 %1236  ;;  %v1207_v18 = vpop.permute.xlu1 %1206  ;;  %v1404_v5 = vmul.f32 %v1403_v17, %v1392_v6 }
 0x1c6   : > { %v1209_v3 = vadd.f32 %v1207_v18, %v1173_v62  ;;  %v1239_v12 = vadd.f32 %v1237_v2, %v1215_v53 }
 0x1c8   : > { %v1227_v9 = vadd.f32 %v1226_v1, %v1209_v3 }
 0x1c9   : > { %v1253_v11 = vpop.permute.xlu0 %1252  ;;  %v1245_v27 = vpop.permute.xlu1 %1244 }
 0x1ca   : > { %v1255_v23 = vadd.f32 %v1253_v11, %v1223_v63  ;;  %v1247_v26 = vadd.f32 %v1245_v27, %v1219_v25 }
 0x1cd   : > { %v1273_v15 = vpop.permute.xlu0 %1272  ;;  %v1261_v16 = vpop.permute.xlu1 %1260 }
 0x1ce   : > { %v1275_v21 = vadd.f32 %v1273_v15, %v1239_v12  ;;  %v1263_v29 = vadd.f32 %v1261_v16, %v1227_v9 }
 0x1d0   : > { %v1304_v4 = vadd.f32 %v1303_v61, %v1275_v21 }
 0x1d1   : > { %v1289_v33 = vpop.permute.xlu0 %1288  ;;  %v1281_v54 = vpop.permute.xlu1 %1280 }
 0x1d2   : > { %v1291_v30 = vadd.f32 %v1289_v33, %v1255_v23  ;;  %v1283_v31 = vadd.f32 %v1281_v54, %v1247_v26 }
 0x1d4   : > { %v1312_v32 = vadd.f32 %v1311_v50, %v1291_v30  ;;  %v1308_v22 = vadd.f32 %v1307_v28, %v1283_v31 }
 0x1d5   : > { %v1326_v35 = vpop.permute.xlu0 %1325  ;;  %v1297_v36 = vpop.permute.xlu1 %1296 }
 0x1d6   : > { %v1299_v8 = vadd.f32 %v1297_v36, %v1263_v29  ;;  %v1328_v40 = vadd.f32 %v1326_v35, %v1304_v4 }
 0x1d8   : > { %v1316_v37 = vadd.f32 %v1315_v34, %v1299_v8 }
 0x1d9   : > { %v1342_v42 = vpop.permute.xlu0 %1341  ;;  %v1334_v39 = vpop.permute.xlu1 %1333 }
 0x1da   : > { %v1344_v19 = vadd.f32 %v1342_v42, %v1312_v32  ;;  %v1336_v47 = vadd.f32 %v1334_v39, %v1308_v22 }
 0x1dd   : > { %v1362_v44 = vpop.permute.xlu0 %1361  ;;  %v1350_v45 = vpop.permute.xlu1 %1349 }
 0x1de   : > { %v1364_v46 = vadd.f32 %v1362_v44, %v1328_v40  ;;  %v1352_v53 = vadd.f32 %v1350_v45, %v1316_v37 }
 0x1e0   : > { %v1393_v41 = vadd.f32 %v1392_v6, %v1364_v46 }
 0x1e1   : > { %v1378_v13 = vpop.permute.xlu0 %1377  ;;  %v1370_v48 = vpop.permute.xlu1 %1369 }
 0x1e2   : > { %v1380_v51 = vadd.f32 %v1378_v13, %v1344_v19  ;;  %v1372_v52 = vadd.f32 %v1370_v48, %v1336_v47 }
 0x1e4   : > { %v1401_v55 = vadd.f32 %v1400_v59, %v1380_v51  ;;  %v1397_v56 = vadd.f32 %v1396_v14, %v1372_v52 }
 0x1e5   : > { %v1415_v57 = vpop.permute.xlu0 %1414  ;;  %v1386_v58 = vpop.permute.xlu1 %1385 }
 0x1e6   : > { %v1388_v60 = vadd.f32 %v1386_v58, %v1352_v53  ;;  %v1417_v25 = vadd.f32 %v1415_v57, %v1393_v41 }
 0x1e8   : > { %v1405_v0 = vadd.f32 %v1404_v5, %v1388_v60 }
 0x1e9   : > { %v1431_v62 = vpop.permute.xlu0 %1430  ;;  %v1423_v63 = vpop.permute.xlu1 %1422 }
 0x1ea   : > { %v1433_v3 = vadd.f32 %v1431_v62, %v1401_v55  ;;  %v1425_v9 = vadd.f32 %v1423_v63, %v1397_v56 }
 0x1ed   : > { %v1451_v1 = vpop.permute.xlu0 %1450  ;;  %v1439_v2 = vpop.permute.xlu1 %1438 }
 0x1ee   : > { %v1453_v18 = vadd.f32 %v1451_v1, %v1417_v25  ;;  %v1441_v15 = vadd.f32 %v1439_v2, %v1405_v0 }
 0x1f0   : > { %vm1478_vm1 = vcmp.ge.f32.partialorder %v1453_v18, 0.0  ;;  %v1479_v7 = vmul.f32 0.2, %v1453_v18 }
 0x1f1   : > { %v1467_v11 = vpop.permute.xlu0 %1466  ;;  %v1459_v27 = vpop.permute.xlu1 %1458 }
 0x1f2   : > { %v1480_v61 = vsel %vm1478_vm1, %v1453_v18, %v1479_v7  ;;  %v1469_v12 = vadd.f32 %v1467_v11, %v1433_v3  ;;  %v1461_v24 = vadd.f32 %v1459_v27, %v1425_v9 }
 0x1f3   : > { %1482 = vst.msk [vmem:[%s2115_s28] sm:$0xff] %vm1481_vm0, %v1480_v61 }
 0x1f4   : > { %vm1488_vm2 = vcmp.ge.f32.partialorder %v1469_v12, 0.0  ;;  %v1489_v16 = vmul.f32 0.2, %v1469_v12  ;;  %vm1483_vm3 = vcmp.ge.f32.partialorder %v1461_v24, 0.0  ;;  %v1484_v20 = vmul.f32 0.2, %v1461_v24 }
 0x1f5   : > { %v1475_v21 = vpop.permute.xlu1 %1474 }
 0x1f6   : > { %v1490_v50 = vsel %vm1488_vm2, %v1469_v12, %v1489_v16  ;;  %v1485_v23 = vsel %vm1483_vm3, %v1461_v24, %v1484_v20  ;;  %v1477_v26 = vadd.f32 %v1475_v21, %v1441_v15 }
 0x1f7   : > { %1769 = vst.msk [vmem:[%s2115_s28 + $0x10] sm:$0xff] %vm1481_vm0, %v1490_v50  ;;  %1768 = vst.msk [vmem:[%s2115_s28 + $0x8] sm:$0xff] %vm1481_vm0, %v1485_v23 }
 0x1f8   : > { %vm1493_vm4 = vcmp.ge.f32.partialorder %v1477_v26, 0.0  ;;  %v1494_v4 = vmul.f32 0.2, %v1477_v26 }
 0x1fa   : > { %v1495_v28 = vsel %vm1493_vm4, %v1477_v26, %v1494_v4 }
 0x1fb   : > { %1770 = vst.msk [vmem:[%s2115_s28 + $0x18] sm:$0xff] %vm1481_vm0, %v1495_v28 }
 0x1fc   : > { %1863 = shalt.err (!%p1860_p2)
}
 0x1fd   : > { %s1864_s28 = scalar_lea.hbm %s2584_s16, 512  ;;  %s1868_s27 = scalar_lea.hbm %s2634_s3, 1024 }
 0x1fe   : > { %p1865_p3 = scmp.ne.s32.totalorder %s2584_s16, %s1864_s28  ;;  %p1869_p8 = scmp.lt.s32.totalorder %s2584_s16, %s2634_s3 }
 0x1ff   : > { %p1870_p9 = scmp.lt.s32.totalorder %s1868_s27, %s1864_s28 }
 0x200   : > { %p1866_p4 = pnand %p1865_p3, %p2640_p10 }
 0x201   : > { %p1871_p5 = por %p1870_p9, %p1869_p8 }
 0x202   : > { %p1867_p7 = pneg %p1866_p4 }
 0x204   : > { %p1872_p11 = pnand %p1871_p5, %p1867_p7 }
 0x206   : > { %1875 = shalt.err (!%p1872_p11)
}
 0x207   : > { %s1924_s30 = smov 128   ;;  %s1925_s5 = smov 256  }
 0x208   : > { %s1926_s19 = smov 8  }
 0x209   : > { %1782 = dma.vmem_to_hbm [thread:$0]  (%p2640_p10), %s2586_s6, 512, %s2584_s16, %s1499_s9, %s1924_s30, %s1925_s5, %s1926_s19  }
 0x20a PF: > { %s1526_s7 = sand.u32 1, %s1904_s12   ;;  %p2641_p12 = scmp.ne.s32.totalorder %s2638_s24, 0 }
 0x20b   : > { %s1527_s8 = scalar_lea.sflag [#allocation6], %s1526_s7 }
 0x20c   : > { %p1789_p13 = pnand %p1616_p6, %p2641_p12 }
 0x20e   : > { %p1790_p0 = pneg %p1789_p13 }
 0x210   : > { %1899 = dma.done.wait (%p1790_p0), %s1527_s8, 512  }
 0x211   : > { %1901 = vsyncadd (%p1790_p0), %s1527_s8, 4294966784  ;;  %p14_p1 = scmp.ge.s32.totalorder %s1972_s18, 4   ;;  %s2642_s12 = smov %s1908_s13 }
 0x212   : > { %s2643_s13 = smov %s1912_s14  ;;  %s2644_s14 = smov %s1984_s21 }
 0x213   : > { %s2645_s15 = smov %s1972_s18  ;;  %16 = sbr.rel (!%p14_p1) target bundleno = 4 (0x4), region = 204 }
 0x218   :  { %1532 = vsyncpa [#allocation6], 1 }
 0x219   :  { %1534 = vsyncpa [#allocation6 + $0x1], 1 }
 0x21a   :  { %1535 = vsyncpa [#allocation7], 1 }
 0x21b   :  { %1537 = vsyncpa [#allocation7 + $0x1], 1 }
 0x21c   :  { %1538 = vsyncmov [#allocation3] }
 0x21f   :  { %s1539_s15 = vpop.sfrf %1538 }
 0x220   :  { %p1775_p6 = scmp.ne.s32.totalorder %s1539_s15, 0 }
 0x222   :  { %1543 = shalt.err (%p1775_p6)  }

</bundles_post_ra>
